<compile_context>
chip_gen: v6e
topology: v6e:2x2x1
jax: 0.10.0
libtpu: 0.0.40
codegen_flags: <defaults>
</compile_context>

<pallas_src>
import functools

import jax
import jax.numpy as jnp
from jax import lax
from jax.experimental import pallas as pl
from jax.experimental.pallas import tpu as pltpu

C_PAD = 128  # class dim padded to one full lane width for a lane-dense logits store


# ---------------------------------------------------------------------------
# In-kernel helpers
# ---------------------------------------------------------------------------
def _layernorm(x, gamma, beta, eps=1e-5):
    # x: (rows, k); gamma/beta: (1, k). PyTorch LayerNorm uses biased variance.
    mu = jnp.mean(x, axis=-1, keepdims=True)
    var = jnp.mean((x - mu) ** 2, axis=-1, keepdims=True)
    return (x - mu) * lax.rsqrt(var + eps) * gamma + beta


# ---------------------------------------------------------------------------
# Fused whole-network kernel: grid = (batch_tiles, depth)
# ---------------------------------------------------------------------------
def _network_kernel(x_ref, wqkv_ref, wu_ref, bu_ref,
                    ln1g_ref, ln1b_ref,
                    ff1w_ref, ff1b_ref, ff2w_ref, ff2b_ref,
                    ln2g_ref, ln2b_ref,
                    headw_ref, headb_ref,
                    o_ref, x_scr,
                    *, heads, num_classes):
    d = pl.program_id(1)                       # depth step (sequential / "arbitrary")
    Bt, T, K = x_ref.shape                     # batch tile, seq len, embedding
    H = heads
    KH = K * H
    rows = Bt * T

    # Load the embedded tokens into the VMEM-resident activation carry at the first block.
    @pl.when(d == 0)
    def _():
        x_scr[...] = x_ref[...].reshape(rows, K)

    x2 = x_scr[...]                            # (rows, K) activations for this block

    # ---- wide multi-head self-attention -----------------------------------
    # Fused Q/K/V projection: one lane-dense matmul, output width 3*K*H.
    qkv = jnp.dot(x2, wqkv_ref[0], preferred_element_type=jnp.float32)   # (rows, 3*K*H)
    scale = 1.0 / (K ** 0.25)                  # q,k each scaled by k**-0.25 (Bloem)
    q = qkv[:, 0 * KH:1 * KH] * scale
    k = qkv[:, 1 * KH:2 * KH] * scale
    v = qkv[:, 2 * KH:3 * KH]

    ctx_heads = []
    for h in range(H):                         # tiny (T x T) per-head attention, unrolled
        qh = q[:, h * K:(h + 1) * K].reshape(Bt, T, K)
        kh = k[:, h * K:(h + 1) * K].reshape(Bt, T, K)
        vh = v[:, h * K:(h + 1) * K].reshape(Bt, T, K)
        s = jnp.einsum('bqd,bkd->bqk', qh, kh, preferred_element_type=jnp.float32)
        s = s - jnp.max(s, axis=-1, keepdims=True)
        p = jnp.exp(s)
        # reciprocal on the EUP slot instead of a VPU divide
        p = p * pl.reciprocal(jnp.sum(p, axis=-1, keepdims=True), approx=True)
        oh = jnp.einsum('bqk,bkd->bqd', p, vh, preferred_element_type=jnp.float32)
        ctx_heads.append(oh.reshape(rows, K))

    # Concatenate heads -> (rows, K*H) (lane-dense, 128 wide) and unify with ONE matmul.
    ctx = jnp.concatenate(ctx_heads, axis=-1)
    attn = jnp.dot(ctx, wu_ref[0], preferred_element_type=jnp.float32) + bu_ref[0]

    # residual + LayerNorm 1
    y = _layernorm(x2 + attn, ln1g_ref[0], ln1b_ref[0])

    # feed-forward: Linear(K, 4K) -> ReLU -> Linear(4K, K)
    hdn = jnp.dot(y, ff1w_ref[0], preferred_element_type=jnp.float32) + ff1b_ref[0]
    hdn = jnp.maximum(hdn, 0.0)
    ffo = jnp.dot(hdn, ff2w_ref[0], preferred_element_type=jnp.float32) + ff2b_ref[0]

    # residual + LayerNorm 2 -> carry to next block
    z = _layernorm(y + ffo, ln2g_ref[0], ln2b_ref[0])
    x_scr[...] = z

    # ---- classifier head fused into the last depth step -------------------
    @pl.when(d == pl.num_programs(1) - 1)
    def _():
        xm = jnp.mean(z.reshape(Bt, T, K), axis=1)                       # (Bt, K)
        logits = (jnp.dot(xm, headw_ref[...], preferred_element_type=jnp.float32)
                  + headb_ref[...])                                      # (Bt, C_PAD)
        cpad = logits.shape[-1]
        col = lax.broadcasted_iota(jnp.int32, (Bt, cpad), 1)
        valid = col < num_classes                                        # mask padded classes
        lm = jnp.where(valid, logits, -1e30)
        m = jnp.max(lm, axis=-1, keepdims=True)
        e = jnp.where(valid, jnp.exp(lm - m), 0.0)
        lse = jnp.log(jnp.sum(e, axis=-1, keepdims=True)) + m
        o_ref[...] = jnp.where(valid, lm - lse, 0.0).reshape(Bt, 1, cpad)


def transformer_network(x, params, *, heads, num_classes):
    """x: (B, T, K) embedded+positional activations -> (B, num_classes) log-probs."""
    B, T, K = x.shape
    depth = params['wqkv'].shape[0]
    # Two batch tiles when possible so the "parallel" axis can shard across v7x's 2 TCs.
    bt_tiles = 2 if (B % 2 == 0 and B >= 2) else 1
    bt = B // bt_tiles

    kernel = functools.partial(_network_kernel, heads=heads, num_classes=num_classes)

    def dspec(*tail):
        n = len(tail)
        return pl.BlockSpec((1, *tail), lambda b, d, n=n: (d,) + (0,) * n)

    out_pad = pl.pallas_call(
        kernel,
        out_shape=jax.ShapeDtypeStruct((B, 1, C_PAD), jnp.float32),
        grid_spec=pltpu.PrefetchScalarGridSpec(
            num_scalar_prefetch=0,
            grid=(bt_tiles, depth),
            in_specs=[
                pl.BlockSpec((bt, T, K), lambda b, d: (b, 0, 0)),        # x (embedded)
                dspec(K, 3 * K * heads),                                 # wqkv
                dspec(K * heads, K),                                     # wu
                dspec(1, K),                                             # bu
                dspec(1, K), dspec(1, K),                                # ln1 gamma/beta
                dspec(K, 4 * K), dspec(1, 4 * K),                        # ff1 w/b
                dspec(4 * K, K), dspec(1, K),                            # ff2 w/b
                dspec(1, K), dspec(1, K),                                # ln2 gamma/beta
                pl.BlockSpec((K, C_PAD), lambda b, d: (0, 0)),           # head w (padded)
                pl.BlockSpec((1, C_PAD), lambda b, d: (0, 0)),           # head b (padded)
            ],
            out_specs=pl.BlockSpec((bt, 1, C_PAD), lambda b, d: (b, 0, 0)),
            scratch_shapes=[pltpu.VMEM((bt * T, K), jnp.float32)],       # activation carry
        ),
        compiler_params=pltpu.CompilerParams(
            dimension_semantics=("parallel", "arbitrary")),
    )(x, params['wqkv'], params['wu'], params['bu'],
      params['ln1_g'], params['ln1_b'],
      params['ff1_w'], params['ff1_b'], params['ff2_w'], params['ff2_b'],
      params['ln2_g'], params['ln2_b'],
      params['toprobs_w'], params['toprobs_b'])

    return out_pad[:, 0, :num_classes]


# ---------------------------------------------------------------------------
# Full forward (embedding gathers are plain-JAX glue)
# ---------------------------------------------------------------------------
@functools.partial(jax.jit, static_argnames=('heads', 'num_classes'))
def transformer_forward(token_ids, params, *, heads, num_classes):
    T = token_ids.shape[1]
    # TODO(synk): embedding gather stays in plain JAX (no clean Pallas win at this scale).
    tokens = jnp.take(params['token_emb'], token_ids, axis=0)            # (B, T, K)
    x = tokens + params['pos_emb'][:T][None, :, :]
    return transformer_network(x, params, heads=heads, num_classes=num_classes)


# ---------------------------------------------------------------------------
# Deterministic parameter init (synthetic — shapes follow the PyTorch module)
# ---------------------------------------------------------------------------
def init_params(key, k, heads, depth, seq_length, num_tokens, num_classes):
    keys = jax.random.split(key, 4 + depth)

    tw = jax.random.normal(keys[2], (k, num_classes), jnp.float32) / jnp.sqrt(k)
    toprobs_w = jnp.zeros((k, C_PAD), jnp.float32).at[:, :num_classes].set(tw)
    toprobs_b = jnp.zeros((1, C_PAD), jnp.float32)

    wqkv, wu, bu = [], [], []
    ln1_g, ln1_b, ff1_w, ff1_b, ff2_w, ff2_b, ln2_g, ln2_b = ([] for _ in range(8))
    for d in range(depth):
        bk = jax.random.split(keys[4 + d], 8)
        wq = jax.random.normal(bk[0], (k, k * heads), jnp.float32) / jnp.sqrt(k)
        wk = jax.random.normal(bk[1], (k, k * heads), jnp.float32) / jnp.sqrt(k)
        wv = jax.random.normal(bk[2], (k, k * heads), jnp.float32) / jnp.sqrt(k)
        wqkv.append(jnp.concatenate([wq, wk, wv], axis=1))               # (k, 3*k*heads)
        wu.append(jax.random.normal(bk[3], (k * heads, k), jnp.float32) / jnp.sqrt(k * heads))
        bu.append(jnp.zeros((1, k), jnp.float32))
        ln1_g.append(jnp.ones((1, k), jnp.float32)); ln1_b.append(jnp.zeros((1, k), jnp.float32))
        ff1_w.append(jax.random.normal(bk[4], (k, 4 * k), jnp.float32) / jnp.sqrt(k))
        ff1_b.append(jnp.zeros((1, 4 * k), jnp.float32))
        ff2_w.append(jax.random.normal(bk[5], (4 * k, k), jnp.float32) / jnp.sqrt(4 * k))
        ff2_b.append(jnp.zeros((1, k), jnp.float32))
        ln2_g.append(jnp.ones((1, k), jnp.float32)); ln2_b.append(jnp.zeros((1, k), jnp.float32))

    return {
        'token_emb': jax.random.normal(keys[0], (num_tokens, k), jnp.float32),
        'pos_emb': jax.random.normal(keys[1], (seq_length, k), jnp.float32),
        'toprobs_w': toprobs_w,
        'toprobs_b': toprobs_b,
        # per-block weights stacked along a leading depth axis (streamed via BlockSpec)
        'wqkv': jnp.stack(wqkv), 'wu': jnp.stack(wu), 'bu': jnp.stack(bu),
        'ln1_g': jnp.stack(ln1_g), 'ln1_b': jnp.stack(ln1_b),
        'ff1_w': jnp.stack(ff1_w), 'ff1_b': jnp.stack(ff1_b),
        'ff2_w': jnp.stack(ff2_w), 'ff2_b': jnp.stack(ff2_b),
        'ln2_g': jnp.stack(ln2_g), 'ln2_b': jnp.stack(ln2_b),
    }


if __name__ == "__main__":
    B, T = 2, 8                    # (b, t) integer token tensor
    K, HEADS, DEPTH = 32, 4, 2
    NUM_TOKENS, NUM_CLASSES = 100, 10

    params = init_params(jax.random.PRNGKey(0), K, HEADS, DEPTH, T, NUM_TOKENS, NUM_CLASSES)
    token_ids = jax.random.randint(jax.random.PRNGKey(1), (B, T), 0, NUM_TOKENS, dtype=jnp.int32)

    out = transformer_forward(token_ids, params, heads=HEADS, num_classes=NUM_CLASSES)
    out = jax.block_until_ready(out)

    assert out.shape == (B, NUM_CLASSES), out.shape
    # log-probabilities: each row must exponentiate-and-sum to ~1
    row_sums = jnp.sum(jnp.exp(out), axis=-1)
    assert jnp.allclose(row_sums, 1.0, atol=1e-4), row_sums
    assert bool(jnp.all(jnp.isfinite(out)))

    print("KERNEL_OK")
</pallas_src>

<mosaic_0001>
module attributes {stable_mosaic.version = 11 : i64} {
  func.func @_network_kernel(%arg0: i32, %arg1: i32, %arg2: memref<1x8x32xf32, #tpu.memory_space<vmem>>, %arg3: memref<1x32x384xf32, #tpu.memory_space<vmem>>, %arg4: memref<1x128x32xf32, #tpu.memory_space<vmem>>, %arg5: memref<1x1x32xf32, #tpu.memory_space<vmem>>, %arg6: memref<1x1x32xf32, #tpu.memory_space<vmem>>, %arg7: memref<1x1x32xf32, #tpu.memory_space<vmem>>, %arg8: memref<1x32x128xf32, #tpu.memory_space<vmem>>, %arg9: memref<1x1x128xf32, #tpu.memory_space<vmem>>, %arg10: memref<1x128x32xf32, #tpu.memory_space<vmem>>, %arg11: memref<1x1x32xf32, #tpu.memory_space<vmem>>, %arg12: memref<1x1x32xf32, #tpu.memory_space<vmem>>, %arg13: memref<1x1x32xf32, #tpu.memory_space<vmem>>, %arg14: memref<32x128xf32, #tpu.memory_space<vmem>>, %arg15: memref<1x128xf32, #tpu.memory_space<vmem>>, %arg16: memref<1x1x128xf32, #tpu.memory_space<vmem>>, %arg17: memref<8x32xf32, #tpu.memory_space<vmem>>) attributes {dimension_semantics = [#tpu.dimension_semantics<parallel>, #tpu.dimension_semantics<arbitrary>], iteration_bounds = array<i64: 2, 2>, scalar_prefetch = 0 : i64, scratch_operands = 1 : i64, tpu.core_type = #tpu.core_type<tc>, window_params = [{transform_indices = @transform_0, window_bounds = array<i64: 1, 8, 32>}, {transform_indices = @transform_1, window_bounds = array<i64: 1, 32, 384>}, {transform_indices = @transform_2, window_bounds = array<i64: 1, 128, 32>}, {transform_indices = @transform_3, window_bounds = array<i64: 1, 1, 32>}, {transform_indices = @transform_4, window_bounds = array<i64: 1, 1, 32>}, {transform_indices = @transform_5, window_bounds = array<i64: 1, 1, 32>}, {transform_indices = @transform_6, window_bounds = array<i64: 1, 32, 128>}, {transform_indices = @transform_7, window_bounds = array<i64: 1, 1, 128>}, {transform_indices = @transform_8, window_bounds = array<i64: 1, 128, 32>}, {transform_indices = @transform_9, window_bounds = array<i64: 1, 1, 32>}, {transform_indices = @transform_10, window_bounds = array<i64: 1, 1, 32>}, {transform_indices = @transform_11, window_bounds = array<i64: 1, 1, 32>}, {pipeline_mode = #tpu.pipeline_mode<synchronous>, transform_indices = @transform_12, window_bounds = array<i64: 32, 128>}, {pipeline_mode = #tpu.pipeline_mode<synchronous>, transform_indices = @transform_13, window_bounds = array<i64: 1, 128>}, {transform_indices = @transform_14, window_bounds = array<i64: 1, 1, 128>}]} {
    %c0_i32 = arith.constant 0 : i32
    %0 = arith.cmpi eq, %arg1, %c0_i32 : i32
    %1 = arith.extui %0 : i1 to i32
    %c0_i32_0 = arith.constant 0 : i32
    %2 = arith.cmpi ne, %1, %c0_i32_0 : i32
    scf.if %2 {
      %c0_70 = arith.constant 0 : index
      %c0_71 = arith.constant 0 : index
      %c0_72 = arith.constant 0 : index
      %172 = vector.load %arg2[%c0_70, %c0_71, %c0_72] : memref<1x8x32xf32, #tpu.memory_space<vmem>>, vector<1x8x32xf32>
      %173 = vector.shape_cast %172 : vector<1x8x32xf32> to vector<8x32xf32>
      %c0_73 = arith.constant 0 : index
      %c0_74 = arith.constant 0 : index
      %174 = vector.load %arg17[%c0_73, %c0_74] : memref<8x32xf32, #tpu.memory_space<vmem>>, vector<8x32xf32>
      tpu.vector_store %arg17[%c0_73, %c0_74], %173 {strides = array<i32>} : memref<8x32xf32, #tpu.memory_space<vmem>>, vector<8x32xf32>,
    } else {
    }
    %c0 = arith.constant 0 : index
    %c0_1 = arith.constant 0 : index
    %3 = vector.load %arg17[%c0, %c0_1] : memref<8x32xf32, #tpu.memory_space<vmem>>, vector<8x32xf32>
    %c0_2 = arith.constant 0 : index
    %c0_3 = arith.constant 0 : index
    %c0_4 = arith.constant 0 : index
    %4 = vector.load %arg3[%c0_2, %c0_3, %c0_4] : memref<1x32x384xf32, #tpu.memory_space<vmem>>, vector<1x32x384xf32>
    %5 = vector.shape_cast %4 : vector<1x32x384xf32> to vector<32x384xf32>
    %cst = arith.constant dense<0.000000e+00> : vector<8x384xf32>
    %6 = tpu.matmul %3, %5, %cst {dimension_numbers = #tpu.dot_dimension_numbers<[1], [0], [0], [1], [0, 0, 1, 1], [], []>} : vector<8x32xf32>, vector<32x384xf32>, vector<8x384xf32> -> vector<8x384xf32>
    %7 = vector.extract_strided_slice %6 {offsets = [0, 0], sizes = [8, 128], strides = [1, 1]} : vector<8x384xf32> to vector<8x128xf32>
    %cst_5 = arith.constant 0.420448214 : f32
    %8 = vector.broadcast %cst_5 : f32 to vector<8x128xf32>
    %9 = arith.mulf %7, %8 : vector<8x128xf32>
    %10 = vector.extract_strided_slice %6 {offsets = [0, 128], sizes = [8, 128], strides = [1, 1]} : vector<8x384xf32> to vector<8x128xf32>
    %cst_6 = arith.constant 0.420448214 : f32
    %11 = vector.broadcast %cst_6 : f32 to vector<8x128xf32>
    %12 = arith.mulf %10, %11 : vector<8x128xf32>
    %13 = vector.extract_strided_slice %6 {offsets = [0, 256], sizes = [8, 128], strides = [1, 1]} : vector<8x384xf32> to vector<8x128xf32>
    %14 = vector.extract_strided_slice %9 {offsets = [0, 0], sizes = [8, 32], strides = [1, 1]} : vector<8x128xf32> to vector<8x32xf32>
    %15 = vector.shape_cast %14 : vector<8x32xf32> to vector<1x8x32xf32>
    %16 = vector.extract_strided_slice %12 {offsets = [0, 0], sizes = [8, 32], strides = [1, 1]} : vector<8x128xf32> to vector<8x32xf32>
    %17 = vector.shape_cast %16 : vector<8x32xf32> to vector<1x8x32xf32>
    %18 = vector.extract_strided_slice %13 {offsets = [0, 0], sizes = [8, 32], strides = [1, 1]} : vector<8x128xf32> to vector<8x32xf32>
    %19 = vector.shape_cast %18 : vector<8x32xf32> to vector<1x8x32xf32>
    "tpu.trace_start"() <{level = 10 : i32, message = "bqd,bkd->bqk"}> : () -> ()
    %cst_7 = arith.constant dense<0.000000e+00> : vector<1x8x8xf32>
    %20 = tpu.matmul %15, %17, %cst_7 {dimension_numbers = #tpu.dot_dimension_numbers<[2], [2], [1], [1], [0, 0, 0, 1, 1, 1], [0], [0]>} : vector<1x8x32xf32>, vector<1x8x32xf32>, vector<1x8x8xf32> -> vector<1x8x8xf32>
    "tpu.trace_stop"() : () -> ()
    %cst_8 = arith.constant dense<0xFF800000> : vector<1x8xf32>
    %21 = vector.multi_reduction <maximumf>, %20, %cst_8 [2] : vector<1x8x8xf32> to vector<1x8xf32>
    %22 = vector.shape_cast %21 : vector<1x8xf32> to vector<1x8x1xf32>
    %23 = vector.broadcast %22 : vector<1x8x1xf32> to vector<1x8x8xf32>
    %24 = arith.subf %20, %23 : vector<1x8x8xf32>
    %25 = math.exp %24 : vector<1x8x8xf32>
    %cst_9 = arith.constant dense<0.000000e+00> : vector<1x8xf32>
    %26 = vector.multi_reduction <add>, %25, %cst_9 [2] : vector<1x8x8xf32> to vector<1x8xf32>
    %27 = vector.shape_cast %26 : vector<1x8xf32> to vector<1x8x1xf32>
    %28 = tpu.reciprocal %27 {approx = true} : vector<1x8x1xf32> -> vector<1x8x1xf32>
    %29 = vector.broadcast %28 : vector<1x8x1xf32> to vector<1x8x8xf32>
    %30 = arith.mulf %25, %29 : vector<1x8x8xf32>
    "tpu.trace_start"() <{level = 10 : i32, message = "bqk,bkd->bqd"}> : () -> ()
    %cst_10 = arith.constant dense<0.000000e+00> : vector<1x8x32xf32>
    %31 = tpu.matmul %30, %19, %cst_10 {dimension_numbers = #tpu.dot_dimension_numbers<[2], [1], [1], [2], [0, 0, 0, 1, 1, 2], [0], [0]>} : vector<1x8x8xf32>, vector<1x8x32xf32>, vector<1x8x32xf32> -> vector<1x8x32xf32>
    "tpu.trace_stop"() : () -> ()
    %32 = vector.shape_cast %31 : vector<1x8x32xf32> to vector<8x32xf32>
    %33 = vector.extract_strided_slice %9 {offsets = [0, 32], sizes = [8, 32], strides = [1, 1]} : vector<8x128xf32> to vector<8x32xf32>
    %34 = vector.shape_cast %33 : vector<8x32xf32> to vector<1x8x32xf32>
    %35 = vector.extract_strided_slice %12 {offsets = [0, 32], sizes = [8, 32], strides = [1, 1]} : vector<8x128xf32> to vector<8x32xf32>
    %36 = vector.shape_cast %35 : vector<8x32xf32> to vector<1x8x32xf32>
    %37 = vector.extract_strided_slice %13 {offsets = [0, 32], sizes = [8, 32], strides = [1, 1]} : vector<8x128xf32> to vector<8x32xf32>
    %38 = vector.shape_cast %37 : vector<8x32xf32> to vector<1x8x32xf32>
    "tpu.trace_start"() <{level = 10 : i32, message = "bqd,bkd->bqk"}> : () -> ()
    %cst_11 = arith.constant dense<0.000000e+00> : vector<1x8x8xf32>
    %39 = tpu.matmul %34, %36, %cst_11 {dimension_numbers = #tpu.dot_dimension_numbers<[2], [2], [1], [1], [0, 0, 0, 1, 1, 1], [0], [0]>} : vector<1x8x32xf32>, vector<1x8x32xf32>, vector<1x8x8xf32> -> vector<1x8x8xf32>
    "tpu.trace_stop"() : () -> ()
    %cst_12 = arith.constant dense<0xFF800000> : vector<1x8xf32>
    %40 = vector.multi_reduction <maximumf>, %39, %cst_12 [2] : vector<1x8x8xf32> to vector<1x8xf32>
    %41 = vector.shape_cast %40 : vector<1x8xf32> to vector<1x8x1xf32>
    %42 = vector.broadcast %41 : vector<1x8x1xf32> to vector<1x8x8xf32>
    %43 = arith.subf %39, %42 : vector<1x8x8xf32>
    %44 = math.exp %43 : vector<1x8x8xf32>
    %cst_13 = arith.constant dense<0.000000e+00> : vector<1x8xf32>
    %45 = vector.multi_reduction <add>, %44, %cst_13 [2] : vector<1x8x8xf32> to vector<1x8xf32>
    %46 = vector.shape_cast %45 : vector<1x8xf32> to vector<1x8x1xf32>
    %47 = tpu.reciprocal %46 {approx = true} : vector<1x8x1xf32> -> vector<1x8x1xf32>
    %48 = vector.broadcast %47 : vector<1x8x1xf32> to vector<1x8x8xf32>
    %49 = arith.mulf %44, %48 : vector<1x8x8xf32>
    "tpu.trace_start"() <{level = 10 : i32, message = "bqk,bkd->bqd"}> : () -> ()
    %cst_14 = arith.constant dense<0.000000e+00> : vector<1x8x32xf32>
    %50 = tpu.matmul %49, %38, %cst_14 {dimension_numbers = #tpu.dot_dimension_numbers<[2], [1], [1], [2], [0, 0, 0, 1, 1, 2], [0], [0]>} : vector<1x8x8xf32>, vector<1x8x32xf32>, vector<1x8x32xf32> -> vector<1x8x32xf32>
    "tpu.trace_stop"() : () -> ()
    %51 = vector.shape_cast %50 : vector<1x8x32xf32> to vector<8x32xf32>
    %52 = vector.extract_strided_slice %9 {offsets = [0, 64], sizes = [8, 32], strides = [1, 1]} : vector<8x128xf32> to vector<8x32xf32>
    %53 = vector.shape_cast %52 : vector<8x32xf32> to vector<1x8x32xf32>
    %54 = vector.extract_strided_slice %12 {offsets = [0, 64], sizes = [8, 32], strides = [1, 1]} : vector<8x128xf32> to vector<8x32xf32>
    %55 = vector.shape_cast %54 : vector<8x32xf32> to vector<1x8x32xf32>
    %56 = vector.extract_strided_slice %13 {offsets = [0, 64], sizes = [8, 32], strides = [1, 1]} : vector<8x128xf32> to vector<8x32xf32>
    %57 = vector.shape_cast %56 : vector<8x32xf32> to vector<1x8x32xf32>
    "tpu.trace_start"() <{level = 10 : i32, message = "bqd,bkd->bqk"}> : () -> ()
    %cst_15 = arith.constant dense<0.000000e+00> : vector<1x8x8xf32>
    %58 = tpu.matmul %53, %55, %cst_15 {dimension_numbers = #tpu.dot_dimension_numbers<[2], [2], [1], [1], [0, 0, 0, 1, 1, 1], [0], [0]>} : vector<1x8x32xf32>, vector<1x8x32xf32>, vector<1x8x8xf32> -> vector<1x8x8xf32>
    "tpu.trace_stop"() : () -> ()
    %cst_16 = arith.constant dense<0xFF800000> : vector<1x8xf32>
    %59 = vector.multi_reduction <maximumf>, %58, %cst_16 [2] : vector<1x8x8xf32> to vector<1x8xf32>
    %60 = vector.shape_cast %59 : vector<1x8xf32> to vector<1x8x1xf32>
    %61 = vector.broadcast %60 : vector<1x8x1xf32> to vector<1x8x8xf32>
    %62 = arith.subf %58, %61 : vector<1x8x8xf32>
    %63 = math.exp %62 : vector<1x8x8xf32>
    %cst_17 = arith.constant dense<0.000000e+00> : vector<1x8xf32>
    %64 = vector.multi_reduction <add>, %63, %cst_17 [2] : vector<1x8x8xf32> to vector<1x8xf32>
    %65 = vector.shape_cast %64 : vector<1x8xf32> to vector<1x8x1xf32>
    %66 = tpu.reciprocal %65 {approx = true} : vector<1x8x1xf32> -> vector<1x8x1xf32>
    %67 = vector.broadcast %66 : vector<1x8x1xf32> to vector<1x8x8xf32>
    %68 = arith.mulf %63, %67 : vector<1x8x8xf32>
    "tpu.trace_start"() <{level = 10 : i32, message = "bqk,bkd->bqd"}> : () -> ()
    %cst_18 = arith.constant dense<0.000000e+00> : vector<1x8x32xf32>
    %69 = tpu.matmul %68, %57, %cst_18 {dimension_numbers = #tpu.dot_dimension_numbers<[2], [1], [1], [2], [0, 0, 0, 1, 1, 2], [0], [0]>} : vector<1x8x8xf32>, vector<1x8x32xf32>, vector<1x8x32xf32> -> vector<1x8x32xf32>
    "tpu.trace_stop"() : () -> ()
    %70 = vector.shape_cast %69 : vector<1x8x32xf32> to vector<8x32xf32>
    %71 = vector.extract_strided_slice %9 {offsets = [0, 96], sizes = [8, 32], strides = [1, 1]} : vector<8x128xf32> to vector<8x32xf32>
    %72 = vector.shape_cast %71 : vector<8x32xf32> to vector<1x8x32xf32>
    %73 = vector.extract_strided_slice %12 {offsets = [0, 96], sizes = [8, 32], strides = [1, 1]} : vector<8x128xf32> to vector<8x32xf32>
    %74 = vector.shape_cast %73 : vector<8x32xf32> to vector<1x8x32xf32>
    %75 = vector.extract_strided_slice %13 {offsets = [0, 96], sizes = [8, 32], strides = [1, 1]} : vector<8x128xf32> to vector<8x32xf32>
    %76 = vector.shape_cast %75 : vector<8x32xf32> to vector<1x8x32xf32>
    "tpu.trace_start"() <{level = 10 : i32, message = "bqd,bkd->bqk"}> : () -> ()
    %cst_19 = arith.constant dense<0.000000e+00> : vector<1x8x8xf32>
    %77 = tpu.matmul %72, %74, %cst_19 {dimension_numbers = #tpu.dot_dimension_numbers<[2], [2], [1], [1], [0, 0, 0, 1, 1, 1], [0], [0]>} : vector<1x8x32xf32>, vector<1x8x32xf32>, vector<1x8x8xf32> -> vector<1x8x8xf32>
    "tpu.trace_stop"() : () -> ()
    %cst_20 = arith.constant dense<0xFF800000> : vector<1x8xf32>
    %78 = vector.multi_reduction <maximumf>, %77, %cst_20 [2] : vector<1x8x8xf32> to vector<1x8xf32>
    %79 = vector.shape_cast %78 : vector<1x8xf32> to vector<1x8x1xf32>
    %80 = vector.broadcast %79 : vector<1x8x1xf32> to vector<1x8x8xf32>
    %81 = arith.subf %77, %80 : vector<1x8x8xf32>
    %82 = math.exp %81 : vector<1x8x8xf32>
    %cst_21 = arith.constant dense<0.000000e+00> : vector<1x8xf32>
    %83 = vector.multi_reduction <add>, %82, %cst_21 [2] : vector<1x8x8xf32> to vector<1x8xf32>
    %84 = vector.shape_cast %83 : vector<1x8xf32> to vector<1x8x1xf32>
    %85 = tpu.reciprocal %84 {approx = true} : vector<1x8x1xf32> -> vector<1x8x1xf32>
    %86 = vector.broadcast %85 : vector<1x8x1xf32> to vector<1x8x8xf32>
    %87 = arith.mulf %82, %86 : vector<1x8x8xf32>
    "tpu.trace_start"() <{level = 10 : i32, message = "bqk,bkd->bqd"}> : () -> ()
    %cst_22 = arith.constant dense<0.000000e+00> : vector<1x8x32xf32>
    %88 = tpu.matmul %87, %76, %cst_22 {dimension_numbers = #tpu.dot_dimension_numbers<[2], [1], [1], [2], [0, 0, 0, 1, 1, 2], [0], [0]>} : vector<1x8x8xf32>, vector<1x8x32xf32>, vector<1x8x32xf32> -> vector<1x8x32xf32>
    "tpu.trace_stop"() : () -> ()
    %89 = vector.shape_cast %88 : vector<1x8x32xf32> to vector<8x32xf32>
    %90 = tpu.concatenate %32, %51, %70, %89 in 1 : vector<8x32xf32>, vector<8x32xf32>, vector<8x32xf32>, vector<8x32xf32> -> vector<8x128xf32>
    %c0_23 = arith.constant 0 : index
    %c0_24 = arith.constant 0 : index
    %c0_25 = arith.constant 0 : index
    %91 = vector.load %arg4[%c0_23, %c0_24, %c0_25] : memref<1x128x32xf32, #tpu.memory_space<vmem>>, vector<1x128x32xf32>
    %92 = vector.shape_cast %91 : vector<1x128x32xf32> to vector<128x32xf32>
    %cst_26 = arith.constant dense<0.000000e+00> : vector<8x32xf32>
    %93 = tpu.matmul %90, %92, %cst_26 {dimension_numbers = #tpu.dot_dimension_numbers<[1], [0], [0], [1], [0, 0, 1, 1], [], []>} : vector<8x128xf32>, vector<128x32xf32>, vector<8x32xf32> -> vector<8x32xf32>
    %c0_27 = arith.constant 0 : index
    %c0_28 = arith.constant 0 : index
    %c0_29 = arith.constant 0 : index
    %94 = vector.load %arg5[%c0_27, %c0_28, %c0_29] : memref<1x1x32xf32, #tpu.memory_space<vmem>>, vector<1x1x32xf32>
    %95 = vector.shape_cast %94 : vector<1x1x32xf32> to vector<1x32xf32>
    %96 = vector.broadcast %95 : vector<1x32xf32> to vector<8x32xf32>
    %97 = arith.addf %93, %96 : vector<8x32xf32>
    %98 = arith.addf %3, %97 : vector<8x32xf32>
    %c0_30 = arith.constant 0 : index
    %c0_31 = arith.constant 0 : index
    %c0_32 = arith.constant 0 : index
    %99 = vector.load %arg6[%c0_30, %c0_31, %c0_32] : memref<1x1x32xf32, #tpu.memory_space<vmem>>, vector<1x1x32xf32>
    %100 = vector.shape_cast %99 : vector<1x1x32xf32> to vector<1x32xf32>
    %c0_33 = arith.constant 0 : index
    %c0_34 = arith.constant 0 : index
    %c0_35 = arith.constant 0 : index
    %101 = vector.load %arg7[%c0_33, %c0_34, %c0_35] : memref<1x1x32xf32, #tpu.memory_space<vmem>>, vector<1x1x32xf32>
    %102 = vector.shape_cast %101 : vector<1x1x32xf32> to vector<1x32xf32>
    %cst_36 = arith.constant dense<0.000000e+00> : vector<8xf32>
    %103 = vector.multi_reduction <add>, %98, %cst_36 [1] : vector<8x32xf32> to vector<8xf32>
    %104 = vector.shape_cast %103 : vector<8xf32> to vector<8x1xf32>
    %cst_37 = arith.constant 3.200000e+01 : f32
    %105 = vector.broadcast %cst_37 : f32 to vector<8x1xf32>
    %106 = arith.divf %104, %105 : vector<8x1xf32>
    %107 = vector.broadcast %106 : vector<8x1xf32> to vector<8x32xf32>
    %108 = arith.subf %98, %107 : vector<8x32xf32>
    %109 = arith.mulf %108, %108 : vector<8x32xf32>
    %cst_38 = arith.constant dense<0.000000e+00> : vector<8xf32>
    %110 = vector.multi_reduction <add>, %109, %cst_38 [1] : vector<8x32xf32> to vector<8xf32>
    %111 = vector.shape_cast %110 : vector<8xf32> to vector<8x1xf32>
    %cst_39 = arith.constant 3.200000e+01 : f32
    %112 = vector.broadcast %cst_39 : f32 to vector<8x1xf32>
    %113 = arith.divf %111, %112 : vector<8x1xf32>
    %114 = vector.broadcast %106 : vector<8x1xf32> to vector<8x32xf32>
    %115 = arith.subf %98, %114 : vector<8x32xf32>
    %cst_40 = arith.constant 9.99999974E-6 : f32
    %116 = vector.broadcast %cst_40 : f32 to vector<8x1xf32>
    %117 = arith.addf %113, %116 : vector<8x1xf32>
    %118 = math.rsqrt %117 : vector<8x1xf32>
    %119 = vector.broadcast %118 : vector<8x1xf32> to vector<8x32xf32>
    %120 = arith.mulf %115, %119 : vector<8x32xf32>
    %121 = vector.broadcast %100 : vector<1x32xf32> to vector<8x32xf32>
    %122 = arith.mulf %120, %121 : vector<8x32xf32>
    %123 = vector.broadcast %102 : vector<1x32xf32> to vector<8x32xf32>
    %124 = arith.addf %122, %123 : vector<8x32xf32>
    %c0_41 = arith.constant 0 : index
    %c0_42 = arith.constant 0 : index
    %c0_43 = arith.constant 0 : index
    %125 = vector.load %arg8[%c0_41, %c0_42, %c0_43] : memref<1x32x128xf32, #tpu.memory_space<vmem>>, vector<1x32x128xf32>
    %126 = vector.shape_cast %125 : vector<1x32x128xf32> to vector<32x128xf32>
    %cst_44 = arith.constant dense<0.000000e+00> : vector<8x128xf32>
    %127 = tpu.matmul %124, %126, %cst_44 {dimension_numbers = #tpu.dot_dimension_numbers<[1], [0], [0], [1], [0, 0, 1, 1], [], []>} : vector<8x32xf32>, vector<32x128xf32>, vector<8x128xf32> -> vector<8x128xf32>
    %c0_45 = arith.constant 0 : index
    %c0_46 = arith.constant 0 : index
    %c0_47 = arith.constant 0 : index
    %128 = vector.load %arg9[%c0_45, %c0_46, %c0_47] : memref<1x1x128xf32, #tpu.memory_space<vmem>>, vector<1x1x128xf32>
    %129 = vector.shape_cast %128 : vector<1x1x128xf32> to vector<1x128xf32>
    %130 = vector.broadcast %129 : vector<1x128xf32> to vector<8x128xf32>
    %131 = arith.addf %127, %130 : vector<8x128xf32>
    %cst_48 = arith.constant 0.000000e+00 : f32
    %132 = vector.broadcast %cst_48 : f32 to vector<8x128xf32>
    %133 = arith.maximumf %131, %132 : vector<8x128xf32>
    %c0_49 = arith.constant 0 : index
    %c0_50 = arith.constant 0 : index
    %c0_51 = arith.constant 0 : index
    %134 = vector.load %arg10[%c0_49, %c0_50, %c0_51] : memref<1x128x32xf32, #tpu.memory_space<vmem>>, vector<1x128x32xf32>
    %135 = vector.shape_cast %134 : vector<1x128x32xf32> to vector<128x32xf32>
    %cst_52 = arith.constant dense<0.000000e+00> : vector<8x32xf32>
    %136 = tpu.matmul %133, %135, %cst_52 {dimension_numbers = #tpu.dot_dimension_numbers<[1], [0], [0], [1], [0, 0, 1, 1], [], []>} : vector<8x128xf32>, vector<128x32xf32>, vector<8x32xf32> -> vector<8x32xf32>
    %c0_53 = arith.constant 0 : index
    %c0_54 = arith.constant 0 : index
    %c0_55 = arith.constant 0 : index
    %137 = vector.load %arg11[%c0_53, %c0_54, %c0_55] : memref<1x1x32xf32, #tpu.memory_space<vmem>>, vector<1x1x32xf32>
    %138 = vector.shape_cast %137 : vector<1x1x32xf32> to vector<1x32xf32>
    %139 = vector.broadcast %138 : vector<1x32xf32> to vector<8x32xf32>
    %140 = arith.addf %136, %139 : vector<8x32xf32>
    %141 = arith.addf %124, %140 : vector<8x32xf32>
    %c0_56 = arith.constant 0 : index
    %c0_57 = arith.constant 0 : index
    %c0_58 = arith.constant 0 : index
    %142 = vector.load %arg12[%c0_56, %c0_57, %c0_58] : memref<1x1x32xf32, #tpu.memory_space<vmem>>, vector<1x1x32xf32>
    %143 = vector.shape_cast %142 : vector<1x1x32xf32> to vector<1x32xf32>
    %c0_59 = arith.constant 0 : index
    %c0_60 = arith.constant 0 : index
    %c0_61 = arith.constant 0 : index
    %144 = vector.load %arg13[%c0_59, %c0_60, %c0_61] : memref<1x1x32xf32, #tpu.memory_space<vmem>>, vector<1x1x32xf32>
    %145 = vector.shape_cast %144 : vector<1x1x32xf32> to vector<1x32xf32>
    %cst_62 = arith.constant dense<0.000000e+00> : vector<8xf32>
    %146 = vector.multi_reduction <add>, %141, %cst_62 [1] : vector<8x32xf32> to vector<8xf32>
    %147 = vector.shape_cast %146 : vector<8xf32> to vector<8x1xf32>
    %cst_63 = arith.constant 3.200000e+01 : f32
    %148 = vector.broadcast %cst_63 : f32 to vector<8x1xf32>
    %149 = arith.divf %147, %148 : vector<8x1xf32>
    %150 = vector.broadcast %149 : vector<8x1xf32> to vector<8x32xf32>
    %151 = arith.subf %141, %150 : vector<8x32xf32>
    %152 = arith.mulf %151, %151 : vector<8x32xf32>
    %cst_64 = arith.constant dense<0.000000e+00> : vector<8xf32>
    %153 = vector.multi_reduction <add>, %152, %cst_64 [1] : vector<8x32xf32> to vector<8xf32>
    %154 = vector.shape_cast %153 : vector<8xf32> to vector<8x1xf32>
    %cst_65 = arith.constant 3.200000e+01 : f32
    %155 = vector.broadcast %cst_65 : f32 to vector<8x1xf32>
    %156 = arith.divf %154, %155 : vector<8x1xf32>
    %157 = vector.broadcast %149 : vector<8x1xf32> to vector<8x32xf32>
    %158 = arith.subf %141, %157 : vector<8x32xf32>
    %cst_66 = arith.constant 9.99999974E-6 : f32
    %159 = vector.broadcast %cst_66 : f32 to vector<8x1xf32>
    %160 = arith.addf %156, %159 : vector<8x1xf32>
    %161 = math.rsqrt %160 : vector<8x1xf32>
    %162 = vector.broadcast %161 : vector<8x1xf32> to vector<8x32xf32>
    %163 = arith.mulf %158, %162 : vector<8x32xf32>
    %164 = vector.broadcast %143 : vector<1x32xf32> to vector<8x32xf32>
    %165 = arith.mulf %163, %164 : vector<8x32xf32>
    %166 = vector.broadcast %145 : vector<1x32xf32> to vector<8x32xf32>
    %167 = arith.addf %165, %166 : vector<8x32xf32>
    %c0_67 = arith.constant 0 : index
    %c0_68 = arith.constant 0 : index
    %168 = vector.load %arg17[%c0_67, %c0_68] : memref<8x32xf32, #tpu.memory_space<vmem>>, vector<8x32xf32>
    tpu.vector_store %arg17[%c0_67, %c0_68], %167 {strides = array<i32>} : memref<8x32xf32, #tpu.memory_space<vmem>>, vector<8x32xf32>,
    %c1_i32 = arith.constant 1 : i32
    %169 = arith.cmpi eq, %arg1, %c1_i32 : i32
    %170 = arith.extui %169 : i1 to i32
    %c0_i32_69 = arith.constant 0 : i32
    %171 = arith.cmpi ne, %170, %c0_i32_69 : i32
    scf.if %171 {
      %172 = vector.shape_cast %167 : vector<8x32xf32> to vector<1x8x32xf32>
      %cst_70 = arith.constant dense<0.000000e+00> : vector<1x32xf32>
      %173 = vector.multi_reduction <add>, %172, %cst_70 [1] : vector<1x8x32xf32> to vector<1x32xf32>
      %cst_71 = arith.constant 8.000000e+00 : f32
      %174 = vector.broadcast %cst_71 : f32 to vector<1x32xf32>
      %175 = arith.divf %173, %174 : vector<1x32xf32>
      %c0_72 = arith.constant 0 : index
      %c0_73 = arith.constant 0 : index
      %176 = vector.load %arg14[%c0_72, %c0_73] : memref<32x128xf32, #tpu.memory_space<vmem>>, vector<32x128xf32>
      %cst_74 = arith.constant dense<0.000000e+00> : vector<1x128xf32>
      %177 = tpu.matmul %175, %176, %cst_74 {dimension_numbers = #tpu.dot_dimension_numbers<[1], [0], [0], [1], [0, 0, 1, 1], [], []>} : vector<1x32xf32>, vector<32x128xf32>, vector<1x128xf32> -> vector<1x128xf32>
      %c0_75 = arith.constant 0 : index
      %c0_76 = arith.constant 0 : index
      %178 = vector.load %arg15[%c0_75, %c0_76] : memref<1x128xf32, #tpu.memory_space<vmem>>, vector<1x128xf32>
      %179 = arith.addf %177, %178 : vector<1x128xf32>
      %180 = tpu.iota {dimensions = array<i32: 1>} : vector<1x128xi32>
      %c10_i32 = arith.constant 10 : i32
      %181 = vector.broadcast %c10_i32 : i32 to vector<1x128xi32>
      %182 = arith.cmpi slt, %180, %181 : vector<1x128xi32>
      %cst_77 = arith.constant -1.000000e+30 : f32
      %183 = vector.broadcast %cst_77 : f32 to vector<1x128xf32>
      %184 = arith.select %182, %179, %183 : vector<1x128xi1>, vector<1x128xf32>
      %cst_78 = arith.constant dense<0xFF800000> : vector<1xf32>
      %185 = vector.multi_reduction <maximumf>, %184, %cst_78 [1] : vector<1x128xf32> to vector<1xf32>
      %186 = vector.shape_cast %185 : vector<1xf32> to vector<1x1xf32>
      %187 = vector.broadcast %186 : vector<1x1xf32> to vector<1x128xf32>
      %188 = arith.subf %184, %187 : vector<1x128xf32>
      %189 = math.exp %188 : vector<1x128xf32>
      %cst_79 = arith.constant 0.000000e+00 : f32
      %190 = vector.broadcast %cst_79 : f32 to vector<1x128xf32>
      %191 = arith.select %182, %189, %190 : vector<1x128xi1>, vector<1x128xf32>
      %cst_80 = arith.constant dense<0.000000e+00> : vector<1xf32>
      %192 = vector.multi_reduction <add>, %191, %cst_80 [1] : vector<1x128xf32> to vector<1xf32>
      %193 = vector.shape_cast %192 : vector<1xf32> to vector<1x1xf32>
      %194 = math.log %193 : vector<1x1xf32>
      %195 = arith.addf %194, %186 : vector<1x1xf32>
      %196 = vector.broadcast %195 : vector<1x1xf32> to vector<1x128xf32>
      %197 = arith.subf %184, %196 : vector<1x128xf32>
      %cst_81 = arith.constant 0.000000e+00 : f32
      %198 = vector.broadcast %cst_81 : f32 to vector<1x128xf32>
      %199 = arith.select %182, %197, %198 : vector<1x128xi1>, vector<1x128xf32>
      %200 = vector.shape_cast %199 : vector<1x128xf32> to vector<1x1x128xf32>
      %c0_82 = arith.constant 0 : index
      %c0_83 = arith.constant 0 : index
      %c0_84 = arith.constant 0 : index
      %201 = vector.load %arg16[%c0_82, %c0_83, %c0_84] : memref<1x1x128xf32, #tpu.memory_space<vmem>>, vector<1x1x128xf32>
      tpu.vector_store %arg16[%c0_82, %c0_83, %c0_84], %200 {strides = array<i32>} : memref<1x1x128xf32, #tpu.memory_space<vmem>>, vector<1x1x128xf32>,
    } else {
    }
    return
  }
  func.func @transform_0(%arg0: i32, %arg1: i32) -> (i32, i32, i32) {
    %c0_i32 = arith.constant 0 : i32
    %c0_i32_0 = arith.constant 0 : i32
    %c0_i32_1 = arith.constant 0 : i32
    return %arg0, %c0_i32, %c0_i32_0 : i32, i32, i32
  }
  func.func @transform_1(%arg0: i32, %arg1: i32) -> (i32, i32, i32) {
    %c0_i32 = arith.constant 0 : i32
    %c0_i32_0 = arith.constant 0 : i32
    %c0_i32_1 = arith.constant 0 : i32
    return %arg1, %c0_i32, %c0_i32_0 : i32, i32, i32
  }
  func.func @transform_2(%arg0: i32, %arg1: i32) -> (i32, i32, i32) {
    %c0_i32 = arith.constant 0 : i32
    %c0_i32_0 = arith.constant 0 : i32
    %c0_i32_1 = arith.constant 0 : i32
    return %arg1, %c0_i32, %c0_i32_0 : i32, i32, i32
  }
  func.func @transform_3(%arg0: i32, %arg1: i32) -> (i32, i32, i32) {
    %c0_i32 = arith.constant 0 : i32
    %c0_i32_0 = arith.constant 0 : i32
    %c0_i32_1 = arith.constant 0 : i32
    return %arg1, %c0_i32, %c0_i32_0 : i32, i32, i32
  }
  func.func @transform_4(%arg0: i32, %arg1: i32) -> (i32, i32, i32) {
    %c0_i32 = arith.constant 0 : i32
    %c0_i32_0 = arith.constant 0 : i32
    %c0_i32_1 = arith.constant 0 : i32
    return %arg1, %c0_i32, %c0_i32_0 : i32, i32, i32
  }
  func.func @transform_5(%arg0: i32, %arg1: i32) -> (i32, i32, i32) {
    %c0_i32 = arith.constant 0 : i32
    %c0_i32_0 = arith.constant 0 : i32
    %c0_i32_1 = arith.constant 0 : i32
    return %arg1, %c0_i32, %c0_i32_0 : i32, i32, i32
  }
  func.func @transform_6(%arg0: i32, %arg1: i32) -> (i32, i32, i32) {
    %c0_i32 = arith.constant 0 : i32
    %c0_i32_0 = arith.constant 0 : i32
    %c0_i32_1 = arith.constant 0 : i32
    return %arg1, %c0_i32, %c0_i32_0 : i32, i32, i32
  }
  func.func @transform_7(%arg0: i32, %arg1: i32) -> (i32, i32, i32) {
    %c0_i32 = arith.constant 0 : i32
    %c0_i32_0 = arith.constant 0 : i32
    %c0_i32_1 = arith.constant 0 : i32
    return %arg1, %c0_i32, %c0_i32_0 : i32, i32, i32
  }
  func.func @transform_8(%arg0: i32, %arg1: i32) -> (i32, i32, i32) {
    %c0_i32 = arith.constant 0 : i32
    %c0_i32_0 = arith.constant 0 : i32
    %c0_i32_1 = arith.constant 0 : i32
    return %arg1, %c0_i32, %c0_i32_0 : i32, i32, i32
  }
  func.func @transform_9(%arg0: i32, %arg1: i32) -> (i32, i32, i32) {
    %c0_i32 = arith.constant 0 : i32
    %c0_i32_0 = arith.constant 0 : i32
    %c0_i32_1 = arith.constant 0 : i32
    return %arg1, %c0_i32, %c0_i32_0 : i32, i32, i32
  }
  func.func @transform_10(%arg0: i32, %arg1: i32) -> (i32, i32, i32) {
    %c0_i32 = arith.constant 0 : i32
    %c0_i32_0 = arith.constant 0 : i32
    %c0_i32_1 = arith.constant 0 : i32
    return %arg1, %c0_i32, %c0_i32_0 : i32, i32, i32
  }
  func.func @transform_11(%arg0: i32, %arg1: i32) -> (i32, i32, i32) {
    %c0_i32 = arith.constant 0 : i32
    %c0_i32_0 = arith.constant 0 : i32
    %c0_i32_1 = arith.constant 0 : i32
    return %arg1, %c0_i32, %c0_i32_0 : i32, i32, i32
  }
  func.func @transform_12(%arg0: i32, %arg1: i32) -> (i32, i32) {
    %c0_i32 = arith.constant 0 : i32
    %c0_i32_0 = arith.constant 0 : i32
    %c0_i32_1 = arith.constant 0 : i32
    return %c0_i32, %c0_i32_0 : i32, i32
  }
  func.func @transform_13(%arg0: i32, %arg1: i32) -> (i32, i32) {
    %c0_i32 = arith.constant 0 : i32
    %c0_i32_0 = arith.constant 0 : i32
    %c0_i32_1 = arith.constant 0 : i32
    return %c0_i32, %c0_i32_0 : i32, i32
  }
  func.func @transform_14(%arg0: i32, %arg1: i32) -> (i32, i32, i32) {
    %c0_i32 = arith.constant 0 : i32
    %c0_i32_0 = arith.constant 0 : i32
    %c0_i32_1 = arith.constant 0 : i32
    return %arg0, %c0_i32, %c0_i32_0 : i32, i32, i32
  }
}

</mosaic_0001>

<bundles_post_ra>
// kernel: transformer_forward.1
= control target key start
LH: loop header
LB: loop body
LE: loop exit
PB: predicated region body
PF: predicated region fallthrough
CT: control target
= control target key end

     0   :  { %s3075_s0 = inlined_call_operand.vmem [shape: f32[2,8,32], index: 0, kind: input, shape index: {}]   ;;  %s3076_s1 = inlined_call_operand.vmem [shape: f32[2,32,384], index: 1, kind: input, shape index: {}]   ;;  %s3077_s2 = inlined_call_operand.vmem [shape: f32[2,128,32], index: 2, kind: input, shape index: {}]   ;;  %s3078_s3 = inlined_call_operand.vmem [shape: f32[2,1,32], index: 3, kind: input, shape index: {}]   ;;  %s3079_s4 = inlined_call_operand.vmem [shape: f32[2,1,32], index: 4, kind: input, shape index: {}]   ;;  %s3080_s5 = inlined_call_operand.vmem [shape: f32[2,1,32], index: 5, kind: input, shape index: {}]   ;;  %s3081_s6 = inlined_call_operand.vmem [shape: f32[2,32,128], index: 6, kind: input, shape index: {}]   ;;  %s3082_s7 = inlined_call_operand.vmem [shape: f32[2,1,128], index: 7, kind: input, shape index: {}]   ;;  %s3083_s8 = inlined_call_operand.vmem [shape: f32[2,128,32], index: 8, kind: input, shape index: {}]   ;;  %s3084_s9 = inlined_call_operand.vmem [shape: f32[2,1,32], index: 9, kind: input, shape index: {}]   ;;  %s3085_s10 = inlined_call_operand.vmem [shape: f32[2,1,32], index: 10, kind: input, shape index: {}]   ;;  %s3086_s11 = inlined_call_operand.vmem [shape: f32[2,1,32], index: 11, kind: input, shape index: {}]   ;;  %s3087_s12 = inlined_call_operand.vmem [shape: f32[32,128], index: 12, kind: input, shape index: {}]   ;;  %s3088_s13 = inlined_call_operand.vmem [shape: f32[1,128], index: 13, kind: input, shape index: {}]   ;;  %s3089_s14 = inlined_call_operand.hbm [shape: f32[2,1,128], index: 14, kind: output, shape index: {}]  }
   0x1   :  { %3104 = sst [smem:[#allocation18_spill]] %s3075_s0 }
   0x2   :  { %3105 = sst [smem:[#allocation19_spill]] %s3076_s1 }
   0x3   :  { %3106 = sst [smem:[#allocation20_spill]] %s3077_s2 }
   0x4   :  { %3107 = sst [smem:[#allocation21_spill]] %s3087_s12 }
   0x5   :  { %3108 = sst [smem:[#allocation22_spill]] %s3088_s13 }
   0x6   :  { %3109 = sst [smem:[#allocation23_spill]] %s3089_s14 }
   0x7   :  { %19 = vsyncpa [#allocation4], 0 }
   0x8   :  { %21 = vsyncpa [#allocation4 + $0x1], 0  ;;  %s2660_s29 = smov 0   ;;  %s2662_s30 = smov 0  }
   0x9   :  { %s2664_s15 = smov 0   ;;  %s2666_s16 = smov 0  }
   0xa   :  { %s2668_s17 = smov 0   ;;  %s2670_s18 = smov 0  }
   0xb   :  { %s2672_s19 = smov 0   ;;  %s2674_s20 = smov 0  }
   0xc LB: > { %3110 = sst [smem:[#allocation6_spill]] %s2547_s29  ;;  %s2128_s21 = sadd.s32 4294967295, %s2575_s20   ;;  %s2575_s20 = sphi %s2674_s20, %s27_s20   ;;  %s2571_s19 = sphi %s2672_s19, %s3148_s19   ;;  %s2567_s18 = sphi %s2670_s18, %s3147_s18   ;;  %s2563_s17 = sphi %s2668_s17, %s3146_s17   ;;  %s2559_s16 = sphi %s2666_s16, %s3145_s16   ;;  %s2555_s15 = sphi %s2664_s15, %s3144_s15   ;;  %s2551_s30 = sphi %s2662_s30, %s3150_s30   ;;  %s2547_s29 = sphi %s2660_s29, %s3149_s29  }
   0xd   : > { %3111 = sst [smem:[#allocation7_spill]] %s2555_s15  ;;  %s2129_s22 = sadd.s32 4294967294, %s2575_s20  }
   0xe   : > { %3112 = sst [smem:[#allocation8_spill]] %s2559_s16  ;;  %s36_s23 = sadd.s32 1, %s2567_s18 }
   0xf   : > { %3113 = sst [smem:[#allocation9_spill]] %s2563_s17  ;;  %p37_p0 = scmp.ge.s32.totalorder %s36_s23, 2 }
  0x10   : > { %3114 = sst [smem:[#allocation10_spill]] %s2567_s18  ;;  %s39_s24 = sadd.s32 1, %s2571_s19 }
  0x11   : > { %3115 = sst [smem:[#allocation11_spill]] %s2571_s19  ;;  %p410_p1 = scmp.ne.s32.totalorder %s2555_s15, %s2551_s30 }
  0x12   : > { %3116 = sst [smem:[#allocation12_spill]] %s2575_s20  ;;  %p411_p2 = scmp.eq.s32.totalorder %s2128_s21, 3 }
  0x13   : > { %s3152_s23 = smov (%p37_p0, %s36_s23), 0  ;;  %s3154_s24 = smov (!%p37_p0, %s39_s24), %s2571_s19 }
  0x14   : > { %3117 = sst [smem:[#allocation13_spill]] %s3152_s23  ;;  %p2709_p3 = por %p411_p2, %p410_p1 }
  0x15   : > { %p416_p4 = scmp.ne.s32.totalorder %s2551_s30, %s2547_s29  ;;  %p41_p5 = scmp.ge.s32.totalorder %s3154_s24, 2 }
  0x16   : > { %s3118_s25 = scalar_select %p2709_p3, 1, 0 }
  0x17   : > { %p417_p6 = scmp.eq.s32.totalorder %s2129_s22, 3  ;;  %p2132_p7 = scmp.ge.s32.totalorder %s2575_s20, 1 }
  0x18   : > { %3119 = sst [smem:[#allocation14_spill]] %s3118_s25  ;;  %p522_p8 = scmp.lt.s32.totalorder %s2575_s20, 5 }
  0x19   : > { %s3156_s24 = smov (%p41_p5, %s3154_s24), 0  ;;  %p2719_p9 = por %p417_p6, %p416_p4 }
  0x1a   : > { %3120 = sst [smem:[#allocation15_spill]] %s3156_s24  ;;  %p523_p10 = pnand %p2132_p7, %p522_p8 }
  0x1b   : > { %s3121_s26 = scalar_select %p2719_p9, 1, 0 }
  0x1c   : > { %s397_s27 = ssub.s32 %s2571_s19, %s3156_s24  ;;  %s400_s28 = sadd.s32 1, %s2555_s15 }
  0x1d   : > { %3122 = sst [smem:[#allocation16_spill]] %s3121_s26  ;;  %p398_p11 = scmp.eq.s32.totalorder %s397_s27, 0 }
  0x1e   : > { %526 = sbr.rel (%p523_p10) target bundleno = 3408 (0xd50), region = 76  ;;  %p607_p12 = scmp.lt.s32.totalorder (!%p523_p10), %s2563_s17, 1 }
  0x1f   : > { %s2727_s21 = scalar_select %p398_p11, %s2555_s15, %s400_s28  }
  0x20   : > { %p611_p13 = scmp.lt.s32.totalorder (!%p523_p10), %s2559_s16, 1  ;;  %s3124_s0 = sld [smem:[#allocation18_spill]] (!%p523_p10) }
  0x21   : > { %3123 = sst [smem:[#allocation17_spill]] %s2727_s21 }
  0x22   : > { %s3125_s1 = sld [smem:[#allocation19_spill]] (!%p523_p10) }
  0x23   : > { %s608_s23 = scalar_select %p607_p12, %s2563_s17, 1 }
  0x24   : > { %s2734_s18 = scalar_select %p611_p13, %s2559_s16, 1 }
  0x25   : > { %s2133_s27 = sshll.u32 %s608_s23, 3  ;;  %s3126_s2 = sld [smem:[#allocation20_spill]] }
  0x26   : > { %s610_s22 = scalar_lea.vmem %s3124_s0, %s2133_s27  ;;  %s2380_s19 = smul.u32 96, %s2734_s18 }
  0x27   : > { %s2169_s21 = sshll.u32 %s2734_s18, 7  ;;  %s2170_s15 = sshll.u32 %s2734_s18, 5 }
  0x28   : > { %s2748_s25 = scalar_lea.vmem %s3125_s1, %s2380_s19  ;;  %s2771_s1 = scalar_lea.vmem %s3081_s6, %s2170_s15 }
  0x29   : > { %s645_s0 = scalar_lea.vmem %s3084_s9, %s2734_s18  ;;  %s648_s27 = scalar_lea.vmem %s3085_s10, %s2734_s18 }
  0x2a   : > { %s651_s14 = scalar_lea.vmem %s3086_s11, %s2734_s18  ;;  %s3127_s19 = sand.u32 1, %s2551_s30  }
  0x2b   : > { %s2753_s23 = scalar_lea.vmem %s3126_s2, %s2169_s21  ;;  %s2776_s2 = scalar_lea.vmem %s3083_s8, %s2169_s21 }
  0x2c   : > { %s2792_s15 = scalar_lea.vmem [#allocation3], %s3127_s19  ;;  %s3128_s20 = sld [smem:[#allocation8_spill]] }
  0x32   : > { %p2141_p0 = scmp.ne.s32.totalorder %s3128_s20, 0 }
  0x34   : > { %655 = sbr.rel (%p2141_p0) target bundleno = 59 (0x3b), region = 80 }
  0x39   : > { %v656_v0 = vld [vmem:[%s610_s22] sm:$0xff]  ;;  %vm657_vm0 = vcmask 261120  }
  0x3a   : > { %658 = vst.msk [vmem:[#allocation2] sm:$0xff] %vm657_vm0, %v656_v0 }
  0x3b PF: > { %v670_v1 = vld [vmem:[%s2748_s25 + $0x50] sm:$0xff]  ;;  %v669_v2 = vld [vmem:[%s2748_s25 + $0x48] sm:$0xff]  ;;  %v667_v3 = vld [vmem:[%s2748_s25 + $0x38] sm:$0xff]  ;;  %v2577_v5 = vmov 0.0   ;;  %vm672_vm1 = vcmask 261120   ;;  %vm2578_vm2 = vmmov 0   ;;  %s3130_s24 = scalar_lea.vmem %s3079_s4, %s2734_s18  ;;  %s3131_s29 = scalar_lea.vmem %s3080_s5, %s2734_s18 }
  0x3c   : > { %700 = vmatprep.subr.mxu0 %v670_v1  ;;  %v666_v4 = vld [vmem:[%s2748_s25 + $0x30] sm:$0xff]  ;;  %740 = vmatprep.mubr.f32.mxu0 %v2577_v5  ;;  %v664_v6 = vld [vmem:[%s2748_s25 + $0x20] sm:$0xff]  ;;  %v663_v7 = vld [vmem:[%s2748_s25 + $0x18] sm:$0xff]  ;;  %s2579_s16 = smov 96   ;;  %s2580_s21 = smov 64   ;;  %vm895_vm3 = vcmask 64512  }
  0x3d   : > { %701 = vmatpush1.msra.mxu0 %v669_v2  ;;  %2237 = vmatprep.subr.mxu1 %v2577_v5  ;;  %v661_v8 = vld [vmem:[%s2748_s25 + $0x8] sm:$0xff]  ;;  %v660_v9 = vld [vmem:[%s2748_s25] sm:$0xff]  ;;  %s2581_s22 = smov 32   ;;  %v671_v15 = vld [vmem:[%s2748_s25 + $0x58] sm:$0xff]  ;;  %vm1489_vm4 = vcmask 523264   ;;  %vm1491_vm5 = vcmask 785408   ;;  %s3132_s20 = scalar_lea.vmem %s3082_s7, %s2734_s18 }
  0x3e   : > { %702 = vmatprep.subr.mxu0 %v667_v3  ;;  %2245 = vmatprep.mubr.msk.f32.mxu1 %vm2578_vm2, %v2577_v5  ;;  %v668_v16 = vld [vmem:[%s2748_s25 + $0x40] sm:$0xff]  ;;  %v665_v17 = vld [vmem:[%s2748_s25 + $0x28] sm:$0xff]  ;;  %v662_v18 = vld [vmem:[%s2748_s25 + $0x10] sm:$0xff]  ;;  %s3133_s13 = sld [smem:[#allocation8_spill]] }
  0x3f   : > { %703 = vmatpush1.msra.mxu0 %v666_v4  ;;  %2238 = vmatpush3.msra.mxu1 %v671_v15  ;;  %v1507_v15 = vld [vmem:[%s2753_s23 + $0x70] sm:$0xff] }
  0x40   : > { %704 = vmatprep.subr.mxu0 %v664_v6  ;;  %2239 = vmatprep.subr.mxu1 %v2577_v5 }
  0x41   : > { %705 = vmatpush1.msra.mxu0 %v663_v7  ;;  %v2805_v10 = vld [vmem:[#allocation2] sm:$0xff]  ;;  %2240 = vmatpush3.msra.mxu1 %v668_v16  ;;  %v1506_v16 = vld [vmem:[%s2753_s23 + $0x68] sm:$0xff] }
  0x42   : > { %706 = vmatprep.subr.mxu0 %v661_v8  ;;  %2241 = vmatprep.subr.mxu1 %v2577_v5 }
  0x43   : > { %707 = vmatpush1.msra.mxu0 %v660_v9  ;;  %2242 = vmatpush3.msra.mxu1 %v665_v17  ;;  %v1505_v17 = vld [vmem:[%s2753_s23 + $0x60] sm:$0xff] }
  0x44   : > { %2142 = vmatmul.mubr.msk.f32.vlgmr.msra.gmra.mxu0 %vm672_vm1, %v2805_v10  ;;  %2248 = vmatprep.subr.mxu0 %v2577_v5  ;;  %p2164_p1 = scmp.ne.s32.totalorder %s3133_s13, 1 }
  0x45   : > { %2250 = vmatprep.mubr.msk.f32.mxu0 %vm2578_vm2, %v2577_v5  ;;  %2243 = vmatprep.subr.mxu1 %v2577_v5  ;;  %s3134_s12 = sld [smem:[#allocation21_spill]] (!%p2164_p1) }
  0x46   : > { %2244 = vmatpush3.msra.mxu1 %v662_v18  ;;  %v1504_v18 = vld [vmem:[%s2753_s23 + $0x58] sm:$0xff]  ;;  %s3135_s19 = sld [smem:[#allocation22_spill]] (!%p2164_p1) }
  0x47   : > { %2246 = vmatmul.mubr.msk.f32.vlgmr.msra.gmra.mxu1 %vm672_vm1, %v2805_v10  ;;  %2263 = vmatprep.subr.mxu1 %v2577_v5 }
  0x48   : > { %2265 = vmatprep.mubr.msk.f32.mxu1 %vm2578_vm2, %v2577_v5 }
 0x104   : > { %v742_v11 = vpop.f32.mrf.mxu0 }
 0x105   : > { %v817_v14 = vmul.f32 0.4204482, %v742_v11 }
 0x106   : > { %v744_v12 = vpop.f32.mrf.mxu0 }
 0x107   : > { %v818_v13 = vmul.f32 0.4204482, %v744_v12  ;;  %v2838_v27 = vpop.f32.mrf.mxu1 }
 0x109   : > { %982 = vrot.lane.b32.xlu1 %v818_v13, %s2579_s16  ;;  %2249 = vmatpush3.xpose.msk.msra.mxu0 %vm672_vm1, %v818_v13  ;;  %v2247_v28 = vpop.f32.mrf.mxu1 }
 0x10a   : > { %2253 = vmatprep.subr.mxu0 %v2577_v5  ;;  %v1498_v28 = vld [vmem:[%s2753_s23 + $0x28] sm:$0xff] }
 0x10c   : > { %2251 = vmatmul.mubr.msk.f32.vlgmr.msra.gmra.mxu0 %vm672_vm1, %v817_v14 }
 0x10d   : > { %980 = vrot.lane.b32.xlu1 %v817_v14, %s2579_s16  ;;  %2255 = vmatprep.mubr.msk.f32.mxu0 %vm2578_vm2, %v2577_v5 }
 0x10e   : > { %2254 = vmatpush3.msra.mxu0 %v2838_v27 }
 0x10f   : > { %2258 = vmatprep.subr.mxu0 %v2577_v5 }
 0x111   : > { %1146 = vrot.lane.b32.xlu1 %v817_v14, %s2580_s21 }
 0x115   : > { %1313 = vrot.lane.b32.xlu1 %v818_v13, %s2581_s22 }
 0x119   : > { %1311 = vrot.lane.b32.xlu1 %v817_v14, %s2581_s22  ;;  %v1508_v14 = vld [vmem:[%s2753_s23 + $0x78] sm:$0xff] }
 0x17b   : > { %v983_v30 = vpop.permute.xlu1 %982 }
 0x17f   : > { %v981_v31 = vpop.permute.xlu1 %980 }
 0x183   : > { %v1147_v34 = vpop.permute.xlu1 %1146 }
 0x187   : > { %v1314_v36 = vpop.permute.xlu1 %1313 }
 0x18b   : > { %v1312_v37 = vpop.permute.xlu1 %1311 }
 0x1cc   : > { %v891_v19 = vpop.f32.mrf.mxu0 }
 0x1cd   : > { %v896_v20 = vsel %vm895_vm3, %v891_v19, -inf }
 0x1ce   : > { %897 = vmax.xlane.f32.xlu0 %v896_v20  ;;  %v2252_v21 = vpop.f32.mrf.mxu0  ;;  %v1503_v20 = vld [vmem:[%s2753_s23 + $0x50] sm:$0xff] }
 0x257   : > { %v898_v22 = vpop.xlane.xlu0 %897 }
 0x258   : > { %v899_v23 = vsub.f32 %v891_v19, %v898_v22  ;;  %v1502_v22 = vld [vmem:[%s2753_s23 + $0x48] sm:$0xff] }
 0x25a   : > { %v900_v24 = vmul.f32 1.442695, %v899_v23 }
 0x25c   : > { %2459 = vpow2.f32 %v900_v24  ;;  %v1501_v24 = vld [vmem:[%s2753_s23 + $0x40] sm:$0xff] }
 0x269   : > { %v2460_v25 = vpop.eup %2459 }
 0x26a   : > { %v902_v26 = vsel %vm895_vm3, %v2460_v25, 0.0 }
 0x26b   : > { %903 = vadd.xlane.f32.xlu0 %v902_v26  ;;  %v1500_v26 = vld [vmem:[%s2753_s23 + $0x38] sm:$0xff] }
 0x281   : > { %1148 = vrot.lane.b32.xlu0 %v818_v13, %s2580_s21 }
 0x2f4   : > { %v904_v29 = vpop.xlane.xlu0 %903 }
 0x2f5   : > { %2461 = vrcp.f32 %v904_v29  ;;  %v1497_v29 = vld [vmem:[%s2753_s23 + $0x20] sm:$0xff] }
 0x2f8   : > { %v1149_v35 = vpop.permute.xlu0 %1148 }
 0x302   : > { %v2462_v32 = vpop.eup %2461 }
 0x303   : > { %v906_v33 = vmul.f32 %v2462_v32, %v2460_v25  ;;  %v1494_v32 = vld [vmem:[%s2753_s23 + $0x8] sm:$0xff] }
 0x305   : > { %2256 = vmatmul.mubr.msk.f32.vlgmr.msra.gmra.mxu0 %vm895_vm3, %v906_v33  ;;  %v1493_v33 = vld [vmem:[%s2753_s23] sm:$0xff] }
 0x306   : > { %2259 = vmatpush3.xpose.msk.msra.mxu0 %vm672_vm1, %v983_v30  ;;  %2260 = vmatprep.mubr.msk.f32.mxu0 %vm2578_vm2, %v2577_v5  ;;  %v1496_v30 = vld [vmem:[%s2753_s23 + $0x18] sm:$0xff] }
 0x307   : > { %2268 = vmatprep.subr.mxu0 %v2577_v5 }
 0x309   : > { %2261 = vmatmul.mubr.msk.f32.vlgmr.msra.gmra.mxu0 %vm672_vm1, %v981_v31  ;;  %v1495_v31 = vld [vmem:[%s2753_s23 + $0x10] sm:$0xff] }
 0x30a   : > { %2269 = vmatpush3.xpose.msk.msra.mxu0 %vm672_vm1, %v1149_v35  ;;  %2270 = vmatprep.mubr.msk.f32.mxu0 %vm2578_vm2, %v2577_v5 }
 0x30b   : > { %2278 = vmatprep.subr.mxu0 %v2577_v5 }
 0x30d   : > { %2271 = vmatmul.mubr.msk.f32.vlgmr.msra.gmra.mxu0 %vm672_vm1, %v1147_v34 }
 0x30e   : > { %2279 = vmatpush3.xpose.msk.msra.mxu0 %vm672_vm1, %v1314_v36  ;;  %2280 = vmatprep.mubr.msk.f32.mxu0 %vm2578_vm2, %v2577_v5 }
 0x30f   : > { %2288 = vmatprep.subr.mxu0 %v2577_v5 }
 0x311   : > { %2281 = vmatmul.mubr.msk.f32.vlgmr.msra.gmra.mxu0 %vm672_vm1, %v1312_v37 }
 0x312   : > { %2320 = vmatprep.mubr.msk.f32.mxu0 %vm2578_vm2, %v2577_v5  ;;  %2289 = vmatpush3.msra.mxu0 %v1508_v14  ;;  %v1706_v14 = vld [vmem:[%s2776_s2 + $0x20] sm:$0xff] }
 0x313   : > { %2290 = vmatprep.subr.mxu0 %v2577_v5 }
 0x314   : > { %2291 = vmatpush3.msra.mxu0 %v1507_v15  ;;  %v1705_v15 = vld [vmem:[%s2776_s2 + $0x18] sm:$0xff] }
 0x315   : > { %2292 = vmatprep.subr.mxu0 %v2577_v5 }
 0x316   : > { %2293 = vmatpush3.msra.mxu0 %v1506_v16  ;;  %v1704_v16 = vld [vmem:[%s2776_s2 + $0x10] sm:$0xff] }
 0x317   : > { %2294 = vmatprep.subr.mxu0 %v2577_v5 }
 0x318   : > { %2295 = vmatpush3.msra.mxu0 %v1505_v17  ;;  %v1703_v17 = vld [vmem:[%s2776_s2 + $0x8] sm:$0xff] }
 0x319   : > { %2296 = vmatprep.subr.mxu0 %v2577_v5 }
 0x31a   : > { %2297 = vmatpush3.msra.mxu0 %v1504_v18  ;;  %v1702_v18 = vld [vmem:[%s2776_s2] sm:$0xff] }
 0x31b   : > { %2298 = vmatprep.subr.mxu0 %v2577_v5 }
 0x31c   : > { %2299 = vmatpush3.msra.mxu0 %v1503_v20 }
 0x31d   : > { %2300 = vmatprep.subr.mxu0 %v2577_v5 }
 0x31e   : > { %2301 = vmatpush3.msra.mxu0 %v1502_v22 }
 0x31f   : > { %2302 = vmatprep.subr.mxu0 %v2577_v5 }
 0x320   : > { %2303 = vmatpush3.msra.mxu0 %v1501_v24  ;;  %v2161_v24 = vld [vmem:[%s645_s0] ss:$0 sm:$0xff] }
 0x321   : > { %2304 = vmatprep.subr.mxu0 %v2577_v5 }
 0x322   : > { %2305 = vmatpush3.msra.mxu0 %v1500_v26 }
 0x323   : > { %2306 = vmatprep.subr.mxu0 %v2577_v5 }
 0x3c5   : > { %v2861_v38 = vpop.f32.mrf.mxu0 }
 0x3c7   : > { %v2257_v39 = vpop.f32.mrf.mxu0 }
 0x3c9   : > { %v1054_v40 = vpop.f32.mrf.mxu0 }
 0x3ca   : > { %v1058_v41 = vsel %vm895_vm3, %v1054_v40, -inf }
 0x3cb   : > { %1059 = vmax.xlane.f32.xlu1 %v1058_v41  ;;  %v2262_v42 = vpop.f32.mrf.mxu0 }
 0x3cd   : > { %v1220_v43 = vpop.f32.mrf.mxu0 }
 0x3ce   : > { %v1224_v44 = vsel %vm895_vm3, %v1220_v43, -inf }
 0x3cf   : > { %1225 = vmax.xlane.f32.xlu0 %v1224_v44  ;;  %v2272_v45 = vpop.f32.mrf.mxu0 }
 0x3d1   : > { %v1385_v46 = vpop.f32.mrf.mxu0 }
 0x3d2   : > { %v1389_v47 = vsel %vm895_vm3, %v1385_v46, -inf }
 0x3d3   : > { %1390 = vmax.xlane.f32.xlu1 %v1389_v47  ;;  %v2282_v48 = vpop.f32.mrf.mxu0 }
 0x454   : > { %v1060_v49 = vpop.xlane.xlu1 %1059 }
 0x455   : > { %v1061_v50 = vsub.f32 %v1054_v40, %v1060_v49 }
 0x457   : > { %v1062_v51 = vmul.f32 1.442695, %v1061_v50 }
 0x458   : > { %v1226_v52 = vpop.xlane.xlu0 %1225 }
 0x459   : > { %2463 = vpow2.f32 %v1062_v51  ;;  %v1227_v53 = vsub.f32 %v1220_v43, %v1226_v52 }
 0x45b   : > { %v1228_v54 = vmul.f32 1.442695, %v1227_v53  ;;  %v1620_v53 = vld [vmem:[%s2771_s1 + $0x18] sm:$0xff] }
 0x45c   : > { %v1391_v59 = vpop.xlane.xlu1 %1390 }
 0x45d   : > { %2465 = vpow2.f32 %v1228_v54  ;;  %v1392_v60 = vsub.f32 %v1385_v46, %v1391_v59  ;;  %v1619_v54 = vld [vmem:[%s2771_s1 + $0x10] sm:$0xff] }
 0x45f   : > { %v1393_v61 = vmul.f32 1.442695, %v1392_v60  ;;  %v2157_v60 = vld [vmem:[%s3130_s24] ss:$0 sm:$0xff] }
 0x461   : > { %2467 = vpow2.f32 %v1393_v61 }
 0x466   : > { %v2464_v55 = vpop.eup %2463 }
 0x467   : > { %v1064_v56 = vsel %vm895_vm3, %v2464_v55, 0.0 }
 0x468   : > { %1065 = vadd.xlane.f32.xlu1 %v1064_v56 }
 0x46a   : > { %v2466_v57 = vpop.eup %2465 }
 0x46b   : > { %v1230_v58 = vsel %vm895_vm3, %v2466_v57, 0.0 }
 0x46c   : > { %1231 = vadd.xlane.f32.xlu0 %v1230_v58 }
 0x46e   : > { %v2468_v62 = vpop.eup %2467 }
 0x46f   : > { %v1395_v63 = vsel %vm895_vm3, %v2468_v62, 0.0 }
 0x479   : > { %1235 = vrot.lane.b32.xlu1 %v2838_v27, %s2580_s21 }
 0x482   : > { %1070 = vrot.lane.b32.xlu0 %v2838_v27, %s2579_s16 }
 0x49d   : > { %1396 = vadd.xlane.f32.xlu1 %v1395_v63 }
 0x4ae   : > { %1400 = vrot.lane.b32.xlu1 %v2838_v27, %s2581_s22  ;;  %v1499_v27 = vld [vmem:[%s2753_s23 + $0x30] sm:$0xff]  ;;  %s3129_s23 = scalar_lea.vmem %s3078_s3, %s2734_s18 }
 0x4af   : > { %2307 = vmatpush3.msra.mxu0 %v1499_v27  ;;  %v2156_v43 = vld [vmem:[%s3129_s23] ss:$0 sm:$0xff] }
 0x4b0   : > { %2308 = vmatprep.subr.mxu0 %v2577_v5 }
 0x4b1   : > { %2309 = vmatpush3.msra.mxu0 %v1498_v28 }
 0x4b2   : > { %2310 = vmatprep.subr.mxu0 %v2577_v5 }
 0x4b3   : > { %2311 = vmatpush3.msra.mxu0 %v1497_v29 }
 0x4b4   : > { %2312 = vmatprep.subr.mxu0 %v2577_v5 }
 0x4b5   : > { %2313 = vmatpush3.msra.mxu0 %v1496_v30 }
 0x4b6   : > { %2314 = vmatprep.subr.mxu0 %v2577_v5 }
 0x4b7   : > { %2315 = vmatpush3.msra.mxu0 %v1495_v31 }
 0x4b8   : > { %2316 = vmatprep.subr.mxu0 %v2577_v5 }
 0x4b9   : > { %2317 = vmatpush3.msra.mxu0 %v1494_v32 }
 0x4ba   : > { %2318 = vmatprep.subr.mxu0 %v2577_v5 }
 0x4bb   : > { %2319 = vmatpush3.msra.mxu0 %v1493_v33 }
 0x4f1   : > { %v1066_v0 = vpop.xlane.xlu1 %1065 }
 0x4f2   : > { %2469 = vrcp.f32 %v1066_v0 }
 0x4f5   : > { %v1232_v1 = vpop.xlane.xlu0 %1231  ;;  %v1236_v6 = vpop.permute.xlu1 %1235 }
 0x4f6   : > { %2471 = vrcp.f32 %v1232_v1  ;;  %v1717_v1 = vld [vmem:[%s2776_s2 + $0x78] sm:$0xff] }
 0x4f9   : > { %v1071_v2 = vpop.permute.xlu0 %1070 }
 0x4fa   : > { %2264 = vmatpush3.msra.mxu1 %v1071_v2  ;;  %v1716_v2 = vld [vmem:[%s2776_s2 + $0x70] sm:$0xff] }
 0x4fb   : > { %2273 = vmatprep.subr.mxu1 %v2577_v5 }
 0x4ff   : > { %v2470_v3 = vpop.eup %2469 }
 0x500   : > { %v1068_v4 = vmul.f32 %v2470_v3, %v2464_v55  ;;  %v1618_v55 = vld [vmem:[%s2771_s1 + $0x8] sm:$0xff] }
 0x501   : > { %v1715_v3 = vld [vmem:[%s2776_s2 + $0x68] sm:$0xff] }
 0x502   : > { %2266 = vmatmul.mubr.msk.f32.vlgmr.msra.gmra.mxu1 %vm895_vm3, %v1068_v4  ;;  %v1714_v4 = vld [vmem:[%s2776_s2 + $0x60] sm:$0xff] }
 0x503   : > { %v2472_v7 = vpop.eup %2471  ;;  %2274 = vmatpush3.msra.mxu1 %v1236_v6  ;;  %2275 = vmatprep.mubr.msk.f32.mxu1 %vm2578_vm2, %v2577_v5  ;;  %v1713_v6 = vld [vmem:[%s2776_s2 + $0x58] sm:$0xff] }
 0x504   : > { %v1234_v8 = vmul.f32 %v2472_v7, %v2466_v57  ;;  %2283 = vmatprep.subr.mxu1 %v2577_v5  ;;  %v1712_v7 = vld [vmem:[%s2776_s2 + $0x50] sm:$0xff] }
 0x506   : > { %2276 = vmatmul.mubr.msk.f32.vlgmr.msra.gmra.mxu1 %vm895_vm3, %v1234_v8  ;;  %v1711_v8 = vld [vmem:[%s2776_s2 + $0x48] sm:$0xff] }
 0x507   : > { %2285 = vmatprep.mubr.msk.f32.mxu1 %vm2578_vm2, %v2577_v5 }
 0x526   : > { %v1397_v9 = vpop.xlane.xlu1 %1396 }
 0x527   : > { %2473 = vrcp.f32 %v1397_v9  ;;  %v1710_v9 = vld [vmem:[%s2776_s2 + $0x40] sm:$0xff] }
 0x52a   : > { %v1401_v11 = vpop.permute.xlu1 %1400 }
 0x52b   : > { %2284 = vmatpush3.msra.mxu1 %v1401_v11  ;;  %v1709_v11 = vld [vmem:[%s2776_s2 + $0x38] sm:$0xff] }
 0x52c   : > { %2323 = vmatprep.subr.mxu1 %v2577_v5 }
 0x534   : > { %v2474_v12 = vpop.eup %2473 }
 0x535   : > { %v1399_v13 = vmul.f32 %v2474_v12, %v2468_v62  ;;  %v2158_v62 = vld [vmem:[%s3131_s29] ss:$0 sm:$0xff]  ;;  %v1708_v12 = vld [vmem:[%s2776_s2 + $0x30] sm:$0xff] }
 0x537   : > { %2286 = vmatmul.mubr.msk.f32.vlgmr.msra.gmra.mxu1 %vm895_vm3, %v1399_v13  ;;  %v1707_v13 = vld [vmem:[%s2776_s2 + $0x28] sm:$0xff] }
 0x538   : > { %2331 = vmatprep.mubr.msk.f32.mxu1 %vm2578_vm2, %v2577_v5  ;;  %2324 = vmatpush3.msra.mxu1 %v1620_v53 }
 0x539   : > { %2325 = vmatprep.subr.mxu1 %v2577_v5 }
 0x53a   : > { %2326 = vmatpush3.msra.mxu1 %v1619_v54 }
 0x53b   : > { %2327 = vmatprep.subr.mxu1 %v2577_v5 }
 0x53c   : > { %2328 = vmatpush3.msra.mxu1 %v1618_v55 }
 0x53d   : > { %2329 = vmatprep.subr.mxu1 %v2577_v5 }
 0x5c2   : > { %v1142_v19 = vpop.f32.mrf.mxu1 }
 0x5c3   : > { %1477 = vrot.lane.b32.xlu0 %v1142_v19, %s2581_s22  ;;  %v2159_v19 = vld [vmem:[%s3132_s20] ss:$0 sm:$0xff] }
 0x5c4   : > { %v2267_v21 = vpop.f32.mrf.mxu1 }
 0x5c6   : > { %v1307_v23 = vpop.f32.mrf.mxu1 }
 0x5c7   : > { %1481 = vrot.lane.b32.xlu1 %v1307_v23, %s2580_s21 }
 0x5c8   : > { %v2277_v25 = vpop.f32.mrf.mxu1 }
 0x5f7   : > { %v1472_v34 = vpop.f32.mrf.mxu1 }
 0x5f8   : > { %1485 = vrot.lane.b32.xlu0 %v1472_v34, %s2579_s16 }
 0x5f9   : > { %v2287_v35 = vpop.f32.mrf.mxu1 }
 0x635   : > { %v1478_v36 = vpop.permute.xlu0 %1477 }
 0x636   : > { %v1488_v39 = vsel %vm672_vm1, %v2861_v38, %v1478_v36 }
 0x639   : > { %v1482_v37 = vpop.permute.xlu1 %1481 }
 0x63a   : > { %v1490_v40 = vsel %vm1489_vm4, %v1488_v39, %v1482_v37  ;;  %v2162_v39 = vld [vmem:[%s648_s27] ss:$0 sm:$0xff] }
 0x66a   : > { %v1486_v41 = vpop.permute.xlu0 %1485 }
 0x66b   : > { %v1492_v42 = vsel %vm1491_vm5, %v1490_v40, %v1486_v41  ;;  %v2163_v41 = vld [vmem:[%s651_s14] ss:$0 sm:$0xff] }
 0x66c   : > { %2321 = vmatmul.mubr.f32.vlgmr.msra.gmra.mxu0 %v1492_v42 }
 0x72c   : > { %v1582_v44 = vpop.f32.mrf.mxu0 }
 0x72d   : > { %v1583_v45 = vadd.f32 %v2156_v43, %v1582_v44 }
 0x72e   : > { %v2322_v46 = vpop.f32.mrf.mxu0 }
 0x72f   : > { %v1586_v47 = vadd.f32 %v1583_v45, %v2805_v10  ;;  %v1617_v10 = vld [vmem:[%s2771_s1] sm:$0xff] }
 0x730   : > { %2330 = vmatpush3.msra.mxu1 %v1617_v10 }
 0x731   : > { %v1589_v38 = vsel %vm672_vm1, %v1586_v47, 0.0  ;;  %2334 = vmatprep.subr.mxu1 %v2577_v5 }
 0x732   : > { %1590 = vadd.xlane.f32.xlu1 %v1589_v38 }
 0x7bb   : > { %v1591_v48 = vpop.xlane.xlu1 %1590 }
 0x7bc   : > { %v1593_v49 = vmul.f32 0.03125, %v1591_v48 }
 0x7be   : > { %v1594_v50 = vsub.f32 %v1586_v47, %v1593_v49 }
 0x7c0   : > { %v1595_v51 = vmul.f32 %v1594_v50, %v1594_v50 }
 0x7c2   : > { %v1596_v52 = vsel %vm672_vm1, %v1595_v51, 0.0 }
 0x7c3   : > { %1597 = vadd.xlane.f32.xlu0 %v1596_v52 }
 0x84c   : > { %v1598_v56 = vpop.xlane.xlu0 %1597 }
 0x84d   : > { %v1599_v57 = vmul.f32 0.03125, %v1598_v56 }
 0x84f   : > { %v1600_v58 = vadd.f32 1e-05, %v1599_v57 }
 0x851   : > { %2475 = vrsqrt.f32 %v1600_v58 }
 0x85e   : > { %v2476_v59 = vpop.eup %2475 }
 0x85f   : > { %v1602_v61 = vmul.f32 %v2476_v59, %v1594_v50 }
 0x861   : > { %v1609_v63 = vmul.f32 %v2157_v60, %v1602_v61 }
 0x863   : > { %v1616_v0 = vadd.f32 %v2158_v62, %v1609_v63 }
 0x865   : > { %2332 = vmatmul.mubr.msk.f32.vlgmr.msra.gmra.mxu1 %vm672_vm1, %v1616_v0 }
 0x866   : > { %2335 = vmatpush3.msra.mxu1 %v1717_v1  ;;  %2366 = vmatprep.mubr.msk.f32.mxu1 %vm2578_vm2, %v2577_v5 }
 0x867   : > { %2336 = vmatprep.subr.mxu1 %v2577_v5 }
 0x868   : > { %2337 = vmatpush3.msra.mxu1 %v1716_v2 }
 0x869   : > { %2338 = vmatprep.subr.mxu1 %v2577_v5 }
 0x86a   : > { %2339 = vmatpush3.msra.mxu1 %v1715_v3 }
 0x86b   : > { %2340 = vmatprep.subr.mxu1 %v2577_v5 }
 0x86c   : > { %2341 = vmatpush3.msra.mxu1 %v1714_v4 }
 0x86d   : > { %2342 = vmatprep.subr.mxu1 %v2577_v5 }
 0x86e   : > { %2343 = vmatpush3.msra.mxu1 %v1713_v6 }
 0x86f   : > { %2344 = vmatprep.subr.mxu1 %v2577_v5 }
 0x870   : > { %2345 = vmatpush3.msra.mxu1 %v1712_v7 }
 0x871   : > { %2346 = vmatprep.subr.mxu1 %v2577_v5 }
 0x872   : > { %2347 = vmatpush3.msra.mxu1 %v1711_v8 }
 0x873   : > { %2348 = vmatprep.subr.mxu1 %v2577_v5 }
 0x874   : > { %2349 = vmatpush3.msra.mxu1 %v1710_v9 }
 0x875   : > { %2350 = vmatprep.subr.mxu1 %v2577_v5 }
 0x876   : > { %2351 = vmatpush3.msra.mxu1 %v1709_v11 }
 0x877   : > { %2352 = vmatprep.subr.mxu1 %v2577_v5 }
 0x878   : > { %2353 = vmatpush3.msra.mxu1 %v1708_v12 }
 0x879   : > { %2354 = vmatprep.subr.mxu1 %v2577_v5 }
 0x87a   : > { %2355 = vmatpush3.msra.mxu1 %v1707_v13 }
 0x87b   : > { %2356 = vmatprep.subr.mxu1 %v2577_v5 }
 0x87c   : > { %2357 = vmatpush3.msra.mxu1 %v1706_v14 }
 0x87d   : > { %2358 = vmatprep.subr.mxu1 %v2577_v5 }
 0x87e   : > { %2359 = vmatpush3.msra.mxu1 %v1705_v15 }
 0x87f   : > { %2360 = vmatprep.subr.mxu1 %v2577_v5 }
 0x880   : > { %2361 = vmatpush3.msra.mxu1 %v1704_v16 }
 0x881   : > { %2362 = vmatprep.subr.mxu1 %v2577_v5 }
 0x882   : > { %2363 = vmatpush3.msra.mxu1 %v1703_v17 }
 0x883   : > { %2364 = vmatprep.subr.mxu1 %v2577_v5 }
 0x884   : > { %2365 = vmatpush3.msra.mxu1 %v1702_v18 }
 0x925   : > { %v1697_v20 = vpop.f32.mrf.mxu1 }
 0x926   : > { %v1698_v21 = vadd.f32 %v2159_v19, %v1697_v20 }
 0x927   : > { %v2333_v22 = vpop.f32.mrf.mxu1 }
 0x928   : > { %v1701_v23 = vmax.f32 %v1698_v21, 0.0 }
 0x92a   : > { %2367 = vmatmul.mubr.f32.vlgmr.msra.gmra.mxu1 %v1701_v23 }
 0x9ea   : > { %v1791_v25 = vpop.f32.mrf.mxu1 }
 0x9eb   : > { %v1792_v26 = vadd.f32 %v2161_v24, %v1791_v25 }
 0x9ec   : > { %v2368_v5 = vpop.f32.mrf.mxu1 }
 0x9ed   : > { %v1795_v27 = vadd.f32 %v1792_v26, %v1616_v0 }
 0x9ef   : > { %v1798_v28 = vsel %vm672_vm1, %v1795_v27, 0.0 }
 0x9f0   : > { %1799 = vadd.xlane.f32.xlu0 %v1798_v28 }
 0xa79   : > { %v1800_v29 = vpop.xlane.xlu0 %1799 }
 0xa7a   : > { %v1801_v30 = vmul.f32 0.03125, %v1800_v29 }
 0xa7c   : > { %v1802_v31 = vsub.f32 %v1795_v27, %v1801_v30 }
 0xa7e   : > { %v1803_v32 = vmul.f32 %v1802_v31, %v1802_v31 }
 0xa80   : > { %v1804_v33 = vsel %vm672_vm1, %v1803_v32, 0.0 }
 0xa81   : > { %1805 = vadd.xlane.f32.xlu1 %v1804_v33 }
 0xb0a   : > { %v1806_v34 = vpop.xlane.xlu1 %1805 }
 0xb0b   : > { %v1807_v35 = vmul.f32 0.03125, %v1806_v34 }
 0xb0d   : > { %v1808_v36 = vadd.f32 1e-05, %v1807_v35 }
 0xb0f   : > { %2477 = vrsqrt.f32 %v1808_v36 }
 0xb1c   : > { %v2478_v37 = vpop.eup %2477 }
 0xb1d   : > { %v1810_v40 = vmul.f32 %v2478_v37, %v1802_v31 }
 0xb1f   : > { %v1817_v42 = vmul.f32 %v2162_v39, %v1810_v40  ;;  %1829 = sbr.rel (%p2164_p1) target bundleno = 3382 (0xd36), region = 84 }
 0xb21   : > { %v1824_v43 = vadd.f32 %v2163_v41, %v1817_v42 }
 0xb23   : > { %1825 = vst.msk [vmem:[#allocation2] sm:$0xff] %vm672_vm1, %v1824_v43 }
 0xb24   : > { %v1842_v44 = vld [vmem:[%s3134_s12 + $0x18] sm:$0xff]  ;;  %v1830_v45 = vsel %vm672_vm1, %v1824_v43, 0.0  ;;  %v2582_v46 = vmov 0.0   ;;  %v1841_v47 = vld [vmem:[%s3134_s12 + $0x10] sm:$0xff]  ;;  %vm2583_vm6 = vmmov 0   ;;  %v1840_v48 = vld [vmem:[%s3134_s12 + $0x8] sm:$0xff]  ;;  %v1917_v10 = vlaneseq }
 0xb25   : > { %2369 = vmatprep.subr.mxu0 %v2582_v46  ;;  %2377 = vmatprep.mubr.msk.f32.mxu0 %vm2583_vm6, %v2582_v46  ;;  %v1831_v38 = vrot.slane %v1830_v45, 4  ;;  %v1839_v50 = vld [vmem:[%s3134_s12] sm:$0xff]  ;;  %vm1921_vm8 = vcmask 1040384  }
 0xb26   : > { %2370 = vmatpush3.msra.mxu0 %v1842_v44  ;;  %v1918_v56 = vand.u32 127, %v1917_v10  ;;  %v1843_v57 = vld [vmem:[%s3135_s19] sm:$0x1] }
 0xb27   : > { %2371 = vmatprep.subr.mxu0 %v2582_v46  ;;  %v1832_v49 = vadd.f32 %v1831_v38, %v1830_v45 }
 0xb28   : > { %2372 = vmatpush3.msra.mxu0 %v1841_v47  ;;  %vm1919_vm7 = vcmp.lt.s32.totalorder %v1918_v56, 10 }
 0xb29   : > { %2373 = vmatprep.subr.mxu0 %v2582_v46  ;;  %v1833_v51 = vrot.slane %v1832_v49, 2 }
 0xb2a   : > { %2374 = vmatpush3.msra.mxu0 %v1840_v48 }
 0xb2b   : > { %2375 = vmatprep.subr.mxu0 %v2582_v46  ;;  %v1834_v52 = vadd.f32 %v1833_v51, %v1832_v49 }
 0xb2c   : > { %2376 = vmatpush3.msra.mxu0 %v1839_v50 }
 0xb2d   : > { %v1835_v53 = vrot.slane %v1834_v52, 1 }
 0xb2f   : > { %v1836_v54 = vadd.f32 %v1835_v53, %v1834_v52 }
 0xb31   : > { %v1838_v55 = vmul.f32 0.125, %v1836_v54 }
 0xb33   : > { %2378 = vmatmul.mubr.msk.f32.vlgmr.msra.gmra.mxu0 %vm672_vm1, %v1838_v55 }
 0xbf3   : > { %v1913_v58 = vpop.f32.mrf.mxu0 }
 0xbf4   : > { %v1914_v59 = vadd.f32 %v1913_v58, %v1843_v57 }
 0xbf5   : > { %v2379_v60 = vpop.f32.mrf.mxu0 }
 0xbf6   : > { %v1920_v61 = vsel %vm1919_vm7, %v1914_v59, -1e+30 }
 0xbf7   : > { %v1922_v62 = vsel %vm1921_vm8, %v1920_v61, -inf }
 0xbf8   : > { %1923 = vmax.xlane.f32.xlu0 %v1922_v62 }
 0xc81   : > { %v1924_v63 = vpop.xlane.xlu0 %1923 }
 0xc82   : > { %v1925_v0 = vsub.f32 %v1920_v61, %v1924_v63 }
 0xc84   : > { %v1926_v1 = vmul.f32 1.442695, %v1925_v0 }
 0xc86   : > { %2479 = vpow2.f32 %v1926_v1 }
 0xc93   : > { %v2480_v2 = vpop.eup %2479 }
 0xc94   : > { %v1928_v3 = vsel %vm1919_vm7, %v2480_v2, 0.0 }
 0xc95   : > { %v1929_v4 = vsel %vm1921_vm8, %v1928_v3, 0.0 }
 0xc96   : > { %1930 = vadd.xlane.f32.xlu0 %v1929_v4 }
 0xd1f   : > { %v1931_v6 = vpop.xlane.xlu0 %1930 }
 0xd20   : > { %2481 = vlog2.f32 %v1931_v6 }
 0xd2d   : > { %v2482_v7 = vpop.eup %2481 }
 0xd2e   : > { %v1933_v8 = vmul.f32 0.6931472, %v2482_v7 }
 0xd30   : > { %v1934_v9 = vadd.f32 %v1933_v8, %v1924_v63 }
 0xd32   : > { %v1935_v11 = vsub.f32 %v1920_v61, %v1934_v9 }
 0xd34   : > { %v1936_v12 = vsel %vm1919_vm7, %v1935_v11, 0.0 }
 0xd35   : > { %1937 = vst [vmem:[%s2792_s15] sm:$0x1] %v1936_v12 }
 0xd36 PF: > { %s3136_s20 = sld [smem:[#allocation9_spill]]  ;;  %s1951_s13 = sshll.u32 %s2792_s15, 4  ;;  %s1952_s13 = int_to_ptr.vmem [resolvable:$true] %s1951_s13 }
 0xd37   : > { %s3138_s22 = sld [smem:[#allocation23_spill]]  ;;  %s3139_s23 = sand.u32 1, %s2551_s30  }
 0xd38   : > { %s1939_s17 = scalar_lea.sflag [#allocation4], %s3139_s23  ;;  %s2483_s27 = scalar_lea.vmem %s1952_s13, 16 }
 0xd39   : > { %p2484_p2 = scmp.ne.s32.totalorder %s1952_s13, %s2483_s27  ;;  %s2584_s24 = smov [#allocation3]  }
 0xd3a   : > { %s2487_s18 = sshll.u32 %s2584_s24, 4  ;;  %s2488_s18 = int_to_ptr.vmem [resolvable:$false] %s2487_s18 }
 0xd3b   : > { %p2485_p4 = pnand %p2484_p2, %p2709_p3  ;;  %s2489_s14 = scalar_lea.vmem %s2488_s18, 32 }
 0xd3c   : > { %s2166_s21 = sshll.u32 %s3136_s20, 4  ;;  %p2490_p6 = scmp.lt.s32.totalorder %s1952_s13, %s2488_s18 }
 0xd3d   : > { %s1949_s25 = scalar_lea.hbm %s3138_s22, %s2166_s21  ;;  %p2486_p5 = pneg %p2485_p4 }
 0xd3e   : > { %p2491_p7 = scmp.lt.s32.totalorder %s2489_s14, %s2483_s27 }
 0xd40   : > { %p2492_p8 = por %p2491_p7, %p2490_p6 }
 0xd42   : > { %p2493_p10 = pnand %p2492_p8, %p2486_p5 }
 0xd44   : > { %2496 = shalt.err (!%p2493_p10)
}
 0xd45   : > { %s2497_s1 = scalar_lea.hbm %s1949_s25, 16  ;;  %s2501_s29 = scalar_lea.hbm %s3138_s22, 32 }
 0xd46   : > { %p2498_p11 = scmp.ne.s32.totalorder %s1949_s25, %s2497_s1  ;;  %p2502_p0 = scmp.lt.s32.totalorder %s1949_s25, %s3138_s22 }
 0xd47   : > { %p2503_p1 = scmp.lt.s32.totalorder %s2501_s29, %s2497_s1 }
 0xd48   : > { %p2499_p12 = pnand %p2498_p11, %p2709_p3 }
 0xd49   : > { %p2504_p2 = por %p2503_p1, %p2502_p0 }
 0xd4a   : > { %p2500_p13 = pneg %p2499_p12 }
 0xd4c   : > { %p2505_p4 = pnand %p2504_p2, %p2500_p13 }
 0xd4e   : > { %2508 = shalt.err (!%p2505_p4)
}
 0xd4f   : > { %2381 = dma.vmem_to_hbm [thread:$0]  (%p2709_p3), %s1952_s13, 16, %s1949_s25, %s1939_s17  }
 0xd50 PF: > { %s3140_s20 = sld [smem:[#allocation12_spill]] }
 0xd51   : > { %s3141_s21 = sld [smem:[#allocation6_spill]] }
 0xd56   : > { %p2387_p5 = scmp.ge.s32.totalorder %s3140_s20, 2 }
 0xd57   : > { %s1963_s0 = sand.u32 1, %s3141_s21  }
 0xd58   : > { %p2384_p6 = pnand %p2387_p5, %p2719_p9  ;;  %s1964_s23 = scalar_lea.sflag [#allocation4], %s1963_s0 }
 0xd5a   : > { %p2385_p7 = pneg %p2384_p6 }
 0xd5c   : > { %2542 = dma.done.wait (%p2385_p7), %s1964_s23, 16  }
 0xd5d   : > { %2544 = vsyncadd (%p2385_p7), %s1964_s23, 4294967280  ;;  %s27_s20 = sadd.s32 1, %s3140_s20   ;;  %s3143_s27 = sld [smem:[#allocation7_spill]] }
 0xd5e   : > { %p24_p8 = scmp.ge.s32.totalorder %s27_s20, 6   ;;  %s3144_s15 = sld [smem:[#allocation17_spill]] }
 0xd5f   : > { %s3145_s16 = sld [smem:[#allocation10_spill]]  ;;  %s3149_s29 = smov %s2551_s30 }
 0xd60   : > { %s3146_s17 = sld [smem:[#allocation11_spill]]  ;;  %26 = sbr.rel (!%p24_p8) target bundleno = 12 (0xc), region = 152 }
 0xd61   : > { %s3147_s18 = sld [smem:[#allocation13_spill]] }
 0xd62   : > { %s3148_s19 = sld [smem:[#allocation15_spill]] }
 0xd63   : > { %s3150_s30 = smov %s3143_s27 }
 0xd65   :  { %1968 = vsyncpa [#allocation4], 1 }
 0xd66   :  { %1970 = vsyncpa [#allocation4 + $0x1], 1 }

</bundles_post_ra>
